<compile_context>
chip_gen: v5e
topology: v5e:2x2
jax: 0.10.0
libtpu: 0.0.40
codegen_flags: <defaults>
</compile_context>

<pallas_src>
import functools

import numpy as np

import jax
import jax.numpy as jnp
from jax.experimental import pallas as pl
from jax.experimental.pallas import tpu as pltpu

F_PAD = 128          # lane-dense feature width for every padded operand
SUB = 16             # sublane-row multiple (16 = safe for bf16 packing)
_VMEM = pl.BlockSpec(memory_space=pltpu.MemorySpace.VMEM)


def _round_up(x, m):
    return ((x + m - 1) // m) * m


# ----------------------------------------------------------------------------
# Fused Pallas kernel: encoders + pstep propagation + both predictors
# ----------------------------------------------------------------------------
def _gns_fused_kernel(x_ref, ra_ref, sn_ref, grt_ref, rragg_ref, keep_ref,
                      w_ref, b_ref, out_ref, *,
                      pstep, N_pad, NR_pad, E_pad, RIG_pad,
                      attr_dim, state_dim, nf_effect):
    f32 = jnp.float32
    bf16 = jnp.bfloat16
    A, S, nf = attr_dim, state_dim, nf_effect
    posL = A + S                                # lane where state starts in X

    def dot(a, b):                              # bf16 MXU, f32 accumulation
        return jnp.dot(a.astype(bf16), b.astype(bf16),
                       preferred_element_type=f32)

    def W(i):                                   # i-th 128x128 weight block
        return w_ref[i * F_PAD:(i + 1) * F_PAD, :]

    def B(i):                                   # i-th [1,128] bias/weight row
        return b_ref[i:i + 1, :]

    relu = lambda v: jnp.maximum(v, 0.0)

    x = x_ref[...]                              # [N_pad,128]  attr|offset|state
    gr = sn_ref[0:NR_pad, :]                    # receiver gather      [NR, N]
    mrs = sn_ref[NR_pad:NR_pad + 2 * E_pad, :]  # [Rr^T Gr ; Rs^T Gs]  [2E, N]
    avg = sn_ref[NR_pad + 2 * E_pad:
                 NR_pad + 2 * E_pad + RIG_pad, :]   # rigid-instance means
    grt = grt_ref[...]                          # receiver scatter     [N, NR]
    rragg = rragg_ref[...]                      # Rr aggregation       [NR, E]
    keep = keep_ref[...]                        # [N_pad,1]  1 = not receiver

    # --- fused gathers (receiver nodes + relation-level receiver/sender) -----
    xr = dot(gr, x)                             # receiver node features
    relg = dot(mrs, x)                          # [2E,128]: Rr^T X_r ; Rs^T X_s
    top = relg[0:E_pad]
    bot = relg[E_pad:2 * E_pad]

    # --- particle encoder (lane-packed concat, pos_mask folded into W0) ------
    h = relu(dot(xr, W(0)) + B(0))
    particle_encode = relu(dot(h, W(1)) + B(1))

    # --- relation encoder -----------------------------------------------------
    diff = top - bot
    lane = jax.lax.broadcasted_iota(jnp.int32, diff.shape, 1)
    d3 = jnp.where((lane >= posL) & (lane < posL + 3), diff, 0.0)
    nrm = jnp.sqrt(jnp.sum(d3 * d3, axis=-1, keepdims=True))    # [E,1]
    h = relu(dot(top, W(2)) + dot(bot, W(3)) + dot(ra_ref[...], W(4))
             + nrm * B(3) + B(2))
    h = relu(dot(h, W(5)) + B(4))
    relation_encode = relu(dot(h, W(6)) + B(5))

    # --- loop-invariant propagator terms hoisted out of the pstep loop -------
    rel_term = dot(relation_encode, W(7)) + B(6)     # relation_encode @ Wrp
    pe_term = dot(particle_encode, W(9)) + B(7)      # particle_encode @ Wpp

    # --- pstep message passing: 5 dots per iteration --------------------------
    def body(_, pe):
        rs = dot(mrs, pe)                       # fused gather + Rr^T/Rs^T agg
        send = jnp.roll(rs[E_pad:2 * E_pad], nf, axis=1)   # -> lanes nf:2nf
        comb = rs[0:E_pad] + send               # recv lanes 0:nf | send nf:2nf
        erel = relu(rel_term + dot(comb, W(8)))
        agg = dot(rragg, erel)
        ep = relu(pe_term + dot(agg, W(10)))
        return keep * pe + dot(grt, ep)         # scatter-set particle_effect

    pe0 = jnp.zeros((N_pad, F_PAD), f32)
    particle_effect = jax.lax.fori_loop(0, pstep, body, pe0, unroll=True)

    # --- predictors: fluid & rigid chains packed block-diagonally -------------
    means = dot(avg, particle_effect)           # per-rigid-instance means
    stacked = jnp.concatenate([particle_effect, means], axis=0)
    h = relu(dot(stacked, W(11)) + B(8))        # fluid lanes 0:nf, rigid nf:2nf
    h = relu(dot(h, W(12)) + B(9))
    out_ref[...] = dot(h, W(13)) + B(10)        # fluid lanes 0:3, rigid nf:nf+7


# ----------------------------------------------------------------------------
# One-time parameter packing (hoisted out of the forward)
# ----------------------------------------------------------------------------
def pack_gns_params(params, attr_dim, state_dim, relation_dim, nf_effect,
                    position_dim):
    A, S = attr_dim, state_dim
    AF = A + S
    nf = nf_effect
    assert A + 2 * S <= F_PAD and 2 * nf <= F_PAD

    def blk():
        return jnp.zeros((F_PAD, F_PAD), jnp.float32)

    w_list = []

    # particle encoder: W0 (lane-packed first layer, pos_mask folded), W1
    (w1, b1), (w2, b2) = params["particle_encoder"]
    w1 = jnp.asarray(w1, jnp.float32)
    w2 = jnp.asarray(w2, jnp.float32)
    st_rows = w1[AF:AF + S].at[0:3].set(0.0)          # pos_mask: zero positions
    w_list.append(blk().at[0:AF, 0:w1.shape[1]].set(w1[0:AF])
                        .at[AF:AF + S, 0:w1.shape[1]].set(st_rows))
    w_list.append(blk().at[0:w2.shape[0], 0:w2.shape[1]].set(w2))

    # relation encoder: W2 top (attr_r_rel + diff), W3 bot (attr_s_rel - diff),
    #                   W4 Ra rows, W5, W6
    (r1, rb1), (r2, rb2), (r3, rb3) = params["relation_encoder"]
    r1 = jnp.asarray(r1, jnp.float32)
    r2 = jnp.asarray(r2, jnp.float32)
    r3 = jnp.asarray(r3, jnp.float32)
    nfr = r1.shape[1]                                 # nf_relation
    assert r1.shape[0] == 2 * AF + 4 + relation_dim
    diff_rows = r1[2 * AF:2 * AF + 3]
    nrm_row = r1[2 * AF + 3:2 * AF + 4]
    ra_rows = r1[2 * AF + 4:2 * AF + 4 + relation_dim]
    w_list.append(blk().at[0:AF, 0:nfr].set(r1[0:AF])
                        .at[AF:AF + 3, 0:nfr].set(diff_rows))
    w_list.append(blk().at[0:AF, 0:nfr].set(r1[AF:2 * AF])
                        .at[AF:AF + 3, 0:nfr].set(-diff_rows))
    w_list.append(blk().at[0:relation_dim, 0:nfr].set(ra_rows))
    w_list.append(blk().at[0:r2.shape[0], 0:r2.shape[1]].set(r2))
    w_list.append(blk().at[0:r3.shape[0], 0:r3.shape[1]].set(r3))

    # relation propagator: W7 (relation_encode rows), W8 (recv|send rows merged)
    wrp, brp = params["relation_propagator"][0]
    wrp = jnp.asarray(wrp, jnp.float32)
    w_list.append(blk().at[0:nfr, 0:nf].set(wrp[0:nfr]))
    w_list.append(blk().at[0:nf, 0:nf].set(wrp[nfr:nfr + nf])
                        .at[nf:2 * nf, 0:nf].set(wrp[nfr + nf:nfr + 2 * nf]))

    # particle propagator (residual=False): W9 (particle_encode), W10 (agg)
    wpp, bpp = params["particle_propagator"][0]
    wpp = jnp.asarray(wpp, jnp.float32)
    w_list.append(blk().at[0:nf, 0:nf].set(wpp[0:nf]))
    w_list.append(blk().at[0:nf, 0:nf].set(wpp[nf:2 * nf]))

    # predictors, block-packed: fluid -> lanes 0:nf, rigid -> lanes nf:2nf
    (fw1, fb1), (fw2, fb2), (fw3, fb3) = [
        (jnp.asarray(w, jnp.float32), jnp.asarray(b, jnp.float32))
        for w, b in params["fluid_particle_predictor"]]
    (rw1, rpb1), (rw2, rpb2), (rw3, rpb3) = [
        (jnp.asarray(w, jnp.float32), jnp.asarray(b, jnp.float32))
        for w, b in params["rigid_particle_predictor"]]
    w_list.append(blk().at[0:nf, 0:nf].set(fw1).at[0:nf, nf:2 * nf].set(rw1))
    w_list.append(blk().at[0:nf, 0:nf].set(fw2)
                        .at[nf:2 * nf, nf:2 * nf].set(rw2))
    w_list.append(blk().at[0:nf, 0:position_dim].set(fw3)
                        .at[nf:2 * nf, nf:nf + 7].set(rw3))

    W_all = jnp.concatenate(w_list, axis=0).astype(jnp.bfloat16)  # [14*128,128]

    rows = jnp.zeros((16, F_PAD), jnp.float32)

    def setrow(rows, i, vec, off=0):
        vec = jnp.asarray(vec, jnp.float32).reshape(-1)
        return rows.at[i, off:off + vec.shape[0]].set(vec)

    rows = setrow(rows, 0, b1)
    rows = setrow(rows, 1, b2)
    rows = setrow(rows, 2, rb1)
    rows = setrow(rows, 3, nrm_row)                 # norm-feature weight row
    rows = setrow(rows, 4, rb2)
    rows = setrow(rows, 5, rb3)
    rows = setrow(rows, 6, brp)
    rows = setrow(rows, 7, bpp)
    rows = setrow(rows, 8, fb1); rows = setrow(rows, 8, rpb1, off=nf)
    rows = setrow(rows, 9, fb2); rows = setrow(rows, 9, rpb2, off=nf)
    rows = setrow(rows, 10, fb3); rows = setrow(rows, 10, rpb3, off=nf)
    return W_all, rows


# ----------------------------------------------------------------------------
# Static graph-structure constants (built ONCE per graph, cached by the caller)
# ----------------------------------------------------------------------------
def build_graph_constants(n_nodes, node_r_idx, node_s_idx, Rr, Rs, Ra,
                          instance_idx, materials):
    node_r_idx = np.asarray(node_r_idx, np.int64)
    node_s_idx = np.asarray(node_s_idx, np.int64)
    # scatter-set (particle_effect[node_r_idx] = ep) requires unique receivers
    assert np.unique(node_r_idx).size == node_r_idx.size
    n_r, n_s = node_r_idx.size, node_s_idx.size
    Rr = np.asarray(Rr, np.float32)
    Rs = np.asarray(Rs, np.float32)
    Ra = np.asarray(Ra, np.float32)
    n_rel = Rr.shape[1]

    N_pad = _round_up(max(n_nodes, SUB), SUB)
    NR_pad = _round_up(max(n_r, SUB), SUB)
    E_pad = _round_up(max(n_rel, SUB), SUB)

    Gr = np.zeros((NR_pad, N_pad), np.float32)
    Gr[np.arange(n_r), node_r_idx] = 1.0
    Gs = np.zeros((n_s, N_pad), np.float32)
    Gs[np.arange(n_s), node_s_idx] = 1.0

    # fused relation-level gathers: Rr^T @ gather_r, Rs^T @ gather_s
    M_r = np.zeros((E_pad, N_pad), np.float32)
    M_r[:n_rel] = Rr.T @ Gr[:n_r]
    M_s = np.zeros((E_pad, N_pad), np.float32)
    M_s[:n_rel] = Rs.T @ Gs

    rig_rows = []
    for i in range(len(instance_idx) - 1):
        st, ed = instance_idx[i], instance_idx[i + 1]
        if materials[i] == "rigid":
            row = np.zeros((N_pad,), np.float32)
            row[st:ed] = 1.0 / (ed - st)
            rig_rows.append(row)
    n_rig = len(rig_rows)
    RIG_pad = _round_up(max(n_rig, 1), SUB)
    AvgRig = np.zeros((RIG_pad, N_pad), np.float32)
    if rig_rows:
        AvgRig[:n_rig] = np.stack(rig_rows)

    SN = np.concatenate([Gr, M_r, M_s, AvgRig], axis=0)   # one structure slab

    GrT = np.ascontiguousarray(Gr.T)                      # scatter [N, NR]
    Rr_agg = np.zeros((NR_pad, E_pad), np.float32)
    Rr_agg[:n_r, :n_rel] = Rr
    keep = np.ones((N_pad, 1), np.float32)
    keep[node_r_idx, 0] = 0.0

    Ra_slab = np.zeros((E_pad, F_PAD), np.float32)
    Ra_slab[:n_rel, :Ra.shape[1]] = Ra

    return dict(
        N_pad=N_pad, NR_pad=NR_pad, E_pad=E_pad, RIG_pad=RIG_pad, n_rig=n_rig,
        SN=jnp.asarray(SN, jnp.bfloat16),
        GrT=jnp.asarray(GrT, jnp.bfloat16),
        Rr_agg=jnp.asarray(Rr_agg, jnp.bfloat16),
        keep=jnp.asarray(keep, jnp.float32),
        Ra=jnp.asarray(Ra_slab, jnp.bfloat16),
    )


# ----------------------------------------------------------------------------
# Tiny JAX glue (quaternion -> rotation)
# ----------------------------------------------------------------------------
def rotation_matrix_from_quaternion(params):
    params = params / jnp.linalg.norm(params)
    w, x, y, z = params[0], params[1], params[2], params[3]
    return jnp.array(
        [[1.0 - y * y * 2 - z * z * 2, x * y * 2 + z * w * 2, x * z * 2 - y * w * 2],
         [x * y * 2 - z * w * 2, 1.0 - x * x * 2 - z * z * 2, y * z * 2 + x * w * 2],
         [x * z * 2 + y * w * 2, y * z * 2 - x * w * 2, 1.0 - x * x * 2 - y * y * 2]],
        dtype=jnp.float32)


# ----------------------------------------------------------------------------
# GNSRigid forward: single pallas_call + tiny per-instance rigid assembly
# ----------------------------------------------------------------------------
def gns_rigid_forward(W_all, B_all, graph, attr, state, instance_idx, materials,
                      pstep, n_particles, attr_dim, state_dim, nf_effect,
                      mean_p, std_p, mean_v, std_v, dt, quat_offset):
    N_pad, NR_pad = graph["N_pad"], graph["NR_pad"]
    E_pad, RIG_pad = graph["E_pad"], graph["RIG_pad"]
    n_nodes = attr.shape[0]
    A, S = attr_dim, state_dim

    # per-rigid-instance offset (zero for fluid / root nodes, as in the ref)
    offset = jnp.zeros_like(state)
    for i in range(len(instance_idx) - 1):
        st, ed = instance_idx[i], instance_idx[i + 1]
        if materials[i] == "rigid":
            offset = offset.at[st:ed].set(
                state[st:ed] - jnp.mean(state[st:ed], axis=0))

    # lane-packed node-feature slab: attr | offset | state  (review item 2)
    X = jnp.zeros((N_pad, F_PAD), jnp.float32)
    X = X.at[:n_nodes, 0:A].set(attr.astype(jnp.float32))
    X = X.at[:n_nodes, A:A + S].set(offset)
    X = X.at[:n_nodes, A + S:A + 2 * S].set(state.astype(jnp.float32))
    X = X.astype(jnp.bfloat16)

    kernel = functools.partial(
        _gns_fused_kernel, pstep=int(pstep), N_pad=N_pad, NR_pad=NR_pad,
        E_pad=E_pad, RIG_pad=RIG_pad, attr_dim=A, state_dim=S,
        nf_effect=nf_effect)

    out = pl.pallas_call(
        kernel,
        out_shape=jax.ShapeDtypeStruct((N_pad + RIG_pad, F_PAD), jnp.float32),
        in_specs=[_VMEM] * 8,
        out_specs=_VMEM,
    )(X, graph["Ra"], graph["SN"], graph["GrT"], graph["Rr_agg"],
      graph["keep"], W_all, B_all)

    fluid_pred = out[:N_pad]          # fluid predictor, lanes 0:3
    rigid_rows = out[N_pad:]          # rigid predictor, lanes nf:nf+7

    preds, rig_k = [], 0
    for i in range(len(instance_idx) - 1):
        st, ed = instance_idx[i], instance_idx[i + 1]
        if materials[i] == "rigid":
            t = rigid_rows[rig_k, nf_effect:nf_effect + 7]
            rig_k += 1
            R = rotation_matrix_from_quaternion(t[:4] + quat_offset)
            b = t[4:7] * std_p
            p_0 = state[st:ed, :3] * std_p + mean_p
            c = jnp.mean(p_0, axis=0)
            # TODO(synk): tiny Nx3 @ 3x3 rigid-body assembly kept as JAX glue.
            p_1 = jnp.dot(p_0 - c, R) + b + c
            v = (p_1 - p_0) / dt
            preds.append((v - mean_v) / std_v)
        elif materials[i] in ("fluid", "cloth"):
            preds.append(fluid_pred[st:ed, :3])
    pred = jnp.concatenate(preds, axis=0)
    return pred[:n_particles]


# ----------------------------------------------------------------------------
# Deterministic setup + run
# ----------------------------------------------------------------------------
if __name__ == "__main__":
    key = jax.random.PRNGKey(0)
    keys = iter(jax.random.split(key, 32))

    attr_dim, state_dim, relation_dim, position_dim = 4, 6, 1, 3
    nf_particle = nf_relation = nf_effect = 32
    n_nodes, n_particles, n_rel = 20, 16, 32
    instance_idx = [0, 8, 16]           # two instances; nodes 16:20 are roots
    materials = ["rigid", "fluid"]
    pstep = [2]
    dt = jnp.float32(0.01 * 1.0)        # args.dt * args.training_fpt

    def linear(in_dim, out_dim):
        k = next(keys)
        kw, kb = jax.random.split(k)
        bound = 1.0 / (in_dim ** 0.5)
        w = jax.random.uniform(kw, (in_dim, out_dim), jnp.float32, -bound, bound)
        b = jax.random.uniform(kb, (out_dim,), jnp.float32, -bound, bound)
        return w, b

    params = {
        "particle_encoder": [
            linear(attr_dim + 2 * state_dim, nf_particle),
            linear(nf_particle, nf_effect),
        ],
        "relation_encoder": [
            linear(2 * attr_dim + 2 * state_dim + 4 + relation_dim, nf_relation),
            linear(nf_relation, nf_relation),
            linear(nf_relation, nf_relation),
        ],
        "relation_propagator": [linear(nf_relation + 2 * nf_effect, nf_effect)],
        "particle_propagator": [linear(2 * nf_effect, nf_effect)],
        "rigid_particle_predictor": [
            linear(nf_effect, nf_effect),
            linear(nf_effect, nf_effect),
            linear(nf_effect, 7),
        ],
        "fluid_particle_predictor": [
            linear(nf_effect, nf_effect),
            linear(nf_effect, nf_effect),
            linear(nf_effect, position_dim),
        ],
    }

    attr = jax.random.normal(next(keys), (n_nodes, attr_dim), jnp.float32)
    state = jax.random.normal(next(keys), (n_nodes, state_dim), jnp.float32)

    recv = jax.random.randint(next(keys), (n_rel,), 0, n_nodes)
    send = jax.random.randint(next(keys), (n_rel,), 0, n_nodes)
    Rr0 = jnp.zeros((n_nodes, n_rel), jnp.float32).at[recv, jnp.arange(n_rel)].set(1.0)
    Rs0 = jnp.zeros((n_nodes, n_rel), jnp.float32).at[send, jnp.arange(n_rel)].set(1.0)
    Ra0 = jax.random.normal(next(keys), (n_rel, relation_dim), jnp.float32)
    node_r_idx = np.arange(n_nodes)
    node_s_idx = np.arange(n_nodes)

    mean_p = jnp.zeros((3,), jnp.float32)
    std_p = jnp.ones((3,), jnp.float32)
    mean_v = jnp.zeros((3,), jnp.float32)
    std_v = jnp.ones((3,), jnp.float32)
    quat_offset = jnp.array([1.0, 0.0, 0.0, 0.0], jnp.float32)

    # one-time packing of weights + graph structure (cached, not per-forward)
    W_all, B_all = pack_gns_params(params, attr_dim, state_dim, relation_dim,
                                   nf_effect, position_dim)
    graph = build_graph_constants(n_nodes, node_r_idx, node_s_idx,
                                  Rr0, Rs0, Ra0, instance_idx, materials)

    out = gns_rigid_forward(W_all, B_all, graph, attr, state, instance_idx,
                            materials, pstep[0], n_particles, attr_dim,
                            state_dim, nf_effect, mean_p, std_p, mean_v,
                            std_v, dt, quat_offset)
    out = jax.block_until_ready(out)
    assert out.shape == (n_particles, 3) and out.dtype == jnp.float32
    print("KERNEL_OK")
</pallas_src>

<mosaic_0001>
module attributes {stable_mosaic.version = 11 : i64} {
  func.func @_gns_fused_kernel(%arg0: memref<32x128xbf16, #tpu.memory_space<vmem>>, %arg1: memref<32x128xbf16, #tpu.memory_space<vmem>>, %arg2: memref<112x32xbf16, #tpu.memory_space<vmem>>, %arg3: memref<32x32xbf16, #tpu.memory_space<vmem>>, %arg4: memref<32x32xbf16, #tpu.memory_space<vmem>>, %arg5: memref<32x1xf32, #tpu.memory_space<vmem>>, %arg6: memref<1792x128xbf16, #tpu.memory_space<vmem>>, %arg7: memref<16x128xf32, #tpu.memory_space<vmem>>, %arg8: memref<48x128xf32, #tpu.memory_space<vmem>>) attributes {dimension_semantics = [], scalar_prefetch = 0 : i64, scratch_operands = 0 : i64, tpu.core_type = #tpu.core_type<tc>} {
    %c0 = arith.constant 0 : index
    %c0_0 = arith.constant 0 : index
    %0 = vector.load %arg0[%c0, %c0_0] : memref<32x128xbf16, #tpu.memory_space<vmem>>, vector<32x128xbf16>
    %c0_1 = arith.constant 0 : index
    %c0_2 = arith.constant 0 : index
    %1 = vector.load %arg2[%c0_1, %c0_2] : memref<112x32xbf16, #tpu.memory_space<vmem>>, vector<32x32xbf16>
    %c32 = arith.constant 32 : index
    %c0_3 = arith.constant 0 : index
    %2 = vector.load %arg2[%c32, %c0_3] : memref<112x32xbf16, #tpu.memory_space<vmem>>, vector<64x32xbf16>
    %c96 = arith.constant 96 : index
    %c0_4 = arith.constant 0 : index
    %3 = vector.load %arg2[%c96, %c0_4] : memref<112x32xbf16, #tpu.memory_space<vmem>>, vector<16x32xbf16>
    %c0_5 = arith.constant 0 : index
    %c0_6 = arith.constant 0 : index
    %4 = vector.load %arg3[%c0_5, %c0_6] : memref<32x32xbf16, #tpu.memory_space<vmem>>, vector<32x32xbf16>
    %c0_7 = arith.constant 0 : index
    %c0_8 = arith.constant 0 : index
    %5 = vector.load %arg4[%c0_7, %c0_8] : memref<32x32xbf16, #tpu.memory_space<vmem>>, vector<32x32xbf16>
    %c0_9 = arith.constant 0 : index
    %c0_10 = arith.constant 0 : index
    %6 = vector.load %arg5[%c0_9, %c0_10] : memref<32x1xf32, #tpu.memory_space<vmem>>, vector<32x1xf32>
    %cst = arith.constant dense<0.000000e+00> : vector<32x128xf32>
    %7 = tpu.matmul %1, %0, %cst {dimension_numbers = #tpu.dot_dimension_numbers<[1], [0], [0], [1], [0, 0, 1, 1], [], []>} : vector<32x32xbf16>, vector<32x128xbf16>, vector<32x128xf32> -> vector<32x128xf32>
    %cst_11 = arith.constant dense<0.000000e+00> : vector<64x128xf32>
    %8 = tpu.matmul %2, %0, %cst_11 {dimension_numbers = #tpu.dot_dimension_numbers<[1], [0], [0], [1], [0, 0, 1, 1], [], []>} : vector<64x32xbf16>, vector<32x128xbf16>, vector<64x128xf32> -> vector<64x128xf32>
    %9 = vector.extract_strided_slice %8 {offsets = [0, 0], sizes = [32, 128], strides = [1, 1]} : vector<64x128xf32> to vector<32x128xf32>
    %10 = vector.extract_strided_slice %8 {offsets = [32, 0], sizes = [32, 128], strides = [1, 1]} : vector<64x128xf32> to vector<32x128xf32>
    %c0_12 = arith.constant 0 : index
    %c0_13 = arith.constant 0 : index
    %11 = vector.load %arg6[%c0_12, %c0_13] : memref<1792x128xbf16, #tpu.memory_space<vmem>>, vector<128x128xbf16>
    %12 = arith.truncf %7 : vector<32x128xf32> to vector<32x128xbf16>
    %cst_14 = arith.constant dense<0.000000e+00> : vector<32x128xf32>
    %13 = tpu.matmul %12, %11, %cst_14 {dimension_numbers = #tpu.dot_dimension_numbers<[1], [0], [0], [1], [0, 0, 1, 1], [], []>} : vector<32x128xbf16>, vector<128x128xbf16>, vector<32x128xf32> -> vector<32x128xf32>
    %c0_15 = arith.constant 0 : index
    %c0_16 = arith.constant 0 : index
    %14 = vector.load %arg7[%c0_15, %c0_16] : memref<16x128xf32, #tpu.memory_space<vmem>>, vector<1x128xf32>
    %15 = vector.broadcast %14 : vector<1x128xf32> to vector<32x128xf32>
    %16 = arith.addf %13, %15 : vector<32x128xf32>
    %cst_17 = arith.constant 0.000000e+00 : f32
    %17 = vector.broadcast %cst_17 : f32 to vector<32x128xf32>
    %18 = arith.maximumf %16, %17 : vector<32x128xf32>
    %c128 = arith.constant 128 : index
    %c0_18 = arith.constant 0 : index
    %19 = vector.load %arg6[%c128, %c0_18] : memref<1792x128xbf16, #tpu.memory_space<vmem>>, vector<128x128xbf16>
    %20 = arith.truncf %18 : vector<32x128xf32> to vector<32x128xbf16>
    %cst_19 = arith.constant dense<0.000000e+00> : vector<32x128xf32>
    %21 = tpu.matmul %20, %19, %cst_19 {dimension_numbers = #tpu.dot_dimension_numbers<[1], [0], [0], [1], [0, 0, 1, 1], [], []>} : vector<32x128xbf16>, vector<128x128xbf16>, vector<32x128xf32> -> vector<32x128xf32>
    %c1 = arith.constant 1 : index
    %c0_20 = arith.constant 0 : index
    %22 = vector.load %arg7[%c1, %c0_20] : memref<16x128xf32, #tpu.memory_space<vmem>>, vector<1x128xf32>
    %23 = vector.broadcast %22 : vector<1x128xf32> to vector<32x128xf32>
    %24 = arith.addf %21, %23 : vector<32x128xf32>
    %cst_21 = arith.constant 0.000000e+00 : f32
    %25 = vector.broadcast %cst_21 : f32 to vector<32x128xf32>
    %26 = arith.maximumf %24, %25 : vector<32x128xf32>
    %27 = arith.subf %9, %10 : vector<32x128xf32>
    %28 = tpu.iota {dimensions = array<i32: 1>} : vector<32x128xi32>
    %c10_i32 = arith.constant 10 : i32
    %29 = vector.broadcast %c10_i32 : i32 to vector<32x128xi32>
    %30 = arith.cmpi sge, %28, %29 : vector<32x128xi32>
    %c13_i32 = arith.constant 13 : i32
    %31 = vector.broadcast %c13_i32 : i32 to vector<32x128xi32>
    %32 = arith.cmpi slt, %28, %31 : vector<32x128xi32>
    %33 = arith.andi %30, %32 : vector<32x128xi1>
    %cst_22 = arith.constant 0.000000e+00 : f32
    %34 = vector.broadcast %cst_22 : f32 to vector<32x128xf32>
    %35 = arith.select %33, %27, %34 : vector<32x128xi1>, vector<32x128xf32>
    %36 = arith.mulf %35, %35 : vector<32x128xf32>
    %cst_23 = arith.constant dense<0.000000e+00> : vector<32xf32>
    %37 = vector.multi_reduction <add>, %36, %cst_23 [1] : vector<32x128xf32> to vector<32xf32>
    %38 = vector.shape_cast %37 : vector<32xf32> to vector<32x1xf32>
    %39 = math.sqrt %38 : vector<32x1xf32>
    %c256 = arith.constant 256 : index
    %c0_24 = arith.constant 0 : index
    %40 = vector.load %arg6[%c256, %c0_24] : memref<1792x128xbf16, #tpu.memory_space<vmem>>, vector<128x128xbf16>
    %41 = arith.truncf %9 : vector<32x128xf32> to vector<32x128xbf16>
    %cst_25 = arith.constant dense<0.000000e+00> : vector<32x128xf32>
    %42 = tpu.matmul %41, %40, %cst_25 {dimension_numbers = #tpu.dot_dimension_numbers<[1], [0], [0], [1], [0, 0, 1, 1], [], []>} : vector<32x128xbf16>, vector<128x128xbf16>, vector<32x128xf32> -> vector<32x128xf32>
    %c384 = arith.constant 384 : index
    %c0_26 = arith.constant 0 : index
    %43 = vector.load %arg6[%c384, %c0_26] : memref<1792x128xbf16, #tpu.memory_space<vmem>>, vector<128x128xbf16>
    %44 = arith.truncf %10 : vector<32x128xf32> to vector<32x128xbf16>
    %cst_27 = arith.constant dense<0.000000e+00> : vector<32x128xf32>
    %45 = tpu.matmul %44, %43, %cst_27 {dimension_numbers = #tpu.dot_dimension_numbers<[1], [0], [0], [1], [0, 0, 1, 1], [], []>} : vector<32x128xbf16>, vector<128x128xbf16>, vector<32x128xf32> -> vector<32x128xf32>
    %46 = arith.addf %42, %45 : vector<32x128xf32>
    %c0_28 = arith.constant 0 : index
    %c0_29 = arith.constant 0 : index
    %47 = vector.load %arg1[%c0_28, %c0_29] : memref<32x128xbf16, #tpu.memory_space<vmem>>, vector<32x128xbf16>
    %c512 = arith.constant 512 : index
    %c0_30 = arith.constant 0 : index
    %48 = vector.load %arg6[%c512, %c0_30] : memref<1792x128xbf16, #tpu.memory_space<vmem>>, vector<128x128xbf16>
    %cst_31 = arith.constant dense<0.000000e+00> : vector<32x128xf32>
    %49 = tpu.matmul %47, %48, %cst_31 {dimension_numbers = #tpu.dot_dimension_numbers<[1], [0], [0], [1], [0, 0, 1, 1], [], []>} : vector<32x128xbf16>, vector<128x128xbf16>, vector<32x128xf32> -> vector<32x128xf32>
    %50 = arith.addf %46, %49 : vector<32x128xf32>
    %c3 = arith.constant 3 : index
    %c0_32 = arith.constant 0 : index
    %51 = vector.load %arg7[%c3, %c0_32] : memref<16x128xf32, #tpu.memory_space<vmem>>, vector<1x128xf32>
    %52 = vector.broadcast %39 : vector<32x1xf32> to vector<32x128xf32>
    %53 = vector.broadcast %51 : vector<1x128xf32> to vector<32x128xf32>
    %54 = arith.mulf %52, %53 : vector<32x128xf32>
    %55 = arith.addf %50, %54 : vector<32x128xf32>
    %c2 = arith.constant 2 : index
    %c0_33 = arith.constant 0 : index
    %56 = vector.load %arg7[%c2, %c0_33] : memref<16x128xf32, #tpu.memory_space<vmem>>, vector<1x128xf32>
    %57 = vector.broadcast %56 : vector<1x128xf32> to vector<32x128xf32>
    %58 = arith.addf %55, %57 : vector<32x128xf32>
    %cst_34 = arith.constant 0.000000e+00 : f32
    %59 = vector.broadcast %cst_34 : f32 to vector<32x128xf32>
    %60 = arith.maximumf %58, %59 : vector<32x128xf32>
    %c640 = arith.constant 640 : index
    %c0_35 = arith.constant 0 : index
    %61 = vector.load %arg6[%c640, %c0_35] : memref<1792x128xbf16, #tpu.memory_space<vmem>>, vector<128x128xbf16>
    %62 = arith.truncf %60 : vector<32x128xf32> to vector<32x128xbf16>
    %cst_36 = arith.constant dense<0.000000e+00> : vector<32x128xf32>
    %63 = tpu.matmul %62, %61, %cst_36 {dimension_numbers = #tpu.dot_dimension_numbers<[1], [0], [0], [1], [0, 0, 1, 1], [], []>} : vector<32x128xbf16>, vector<128x128xbf16>, vector<32x128xf32> -> vector<32x128xf32>
    %c4 = arith.constant 4 : index
    %c0_37 = arith.constant 0 : index
    %64 = vector.load %arg7[%c4, %c0_37] : memref<16x128xf32, #tpu.memory_space<vmem>>, vector<1x128xf32>
    %65 = vector.broadcast %64 : vector<1x128xf32> to vector<32x128xf32>
    %66 = arith.addf %63, %65 : vector<32x128xf32>
    %cst_38 = arith.constant 0.000000e+00 : f32
    %67 = vector.broadcast %cst_38 : f32 to vector<32x128xf32>
    %68 = arith.maximumf %66, %67 : vector<32x128xf32>
    %c768 = arith.constant 768 : index
    %c0_39 = arith.constant 0 : index
    %69 = vector.load %arg6[%c768, %c0_39] : memref<1792x128xbf16, #tpu.memory_space<vmem>>, vector<128x128xbf16>
    %70 = arith.truncf %68 : vector<32x128xf32> to vector<32x128xbf16>
    %cst_40 = arith.constant dense<0.000000e+00> : vector<32x128xf32>
    %71 = tpu.matmul %70, %69, %cst_40 {dimension_numbers = #tpu.dot_dimension_numbers<[1], [0], [0], [1], [0, 0, 1, 1], [], []>} : vector<32x128xbf16>, vector<128x128xbf16>, vector<32x128xf32> -> vector<32x128xf32>
    %c5 = arith.constant 5 : index
    %c0_41 = arith.constant 0 : index
    %72 = vector.load %arg7[%c5, %c0_41] : memref<16x128xf32, #tpu.memory_space<vmem>>, vector<1x128xf32>
    %73 = vector.broadcast %72 : vector<1x128xf32> to vector<32x128xf32>
    %74 = arith.addf %71, %73 : vector<32x128xf32>
    %cst_42 = arith.constant 0.000000e+00 : f32
    %75 = vector.broadcast %cst_42 : f32 to vector<32x128xf32>
    %76 = arith.maximumf %74, %75 : vector<32x128xf32>
    %c896 = arith.constant 896 : index
    %c0_43 = arith.constant 0 : index
    %77 = vector.load %arg6[%c896, %c0_43] : memref<1792x128xbf16, #tpu.memory_space<vmem>>, vector<128x128xbf16>
    %78 = arith.truncf %76 : vector<32x128xf32> to vector<32x128xbf16>
    %cst_44 = arith.constant dense<0.000000e+00> : vector<32x128xf32>
    %79 = tpu.matmul %78, %77, %cst_44 {dimension_numbers = #tpu.dot_dimension_numbers<[1], [0], [0], [1], [0, 0, 1, 1], [], []>} : vector<32x128xbf16>, vector<128x128xbf16>, vector<32x128xf32> -> vector<32x128xf32>
    %c6 = arith.constant 6 : index
    %c0_45 = arith.constant 0 : index
    %80 = vector.load %arg7[%c6, %c0_45] : memref<16x128xf32, #tpu.memory_space<vmem>>, vector<1x128xf32>
    %81 = vector.broadcast %80 : vector<1x128xf32> to vector<32x128xf32>
    %82 = arith.addf %79, %81 : vector<32x128xf32>
    %c1152 = arith.constant 1152 : index
    %c0_46 = arith.constant 0 : index
    %83 = vector.load %arg6[%c1152, %c0_46] : memref<1792x128xbf16, #tpu.memory_space<vmem>>, vector<128x128xbf16>
    %84 = arith.truncf %26 : vector<32x128xf32> to vector<32x128xbf16>
    %cst_47 = arith.constant dense<0.000000e+00> : vector<32x128xf32>
    %85 = tpu.matmul %84, %83, %cst_47 {dimension_numbers = #tpu.dot_dimension_numbers<[1], [0], [0], [1], [0, 0, 1, 1], [], []>} : vector<32x128xbf16>, vector<128x128xbf16>, vector<32x128xf32> -> vector<32x128xf32>
    %c7 = arith.constant 7 : index
    %c0_48 = arith.constant 0 : index
    %86 = vector.load %arg7[%c7, %c0_48] : memref<16x128xf32, #tpu.memory_space<vmem>>, vector<1x128xf32>
    %87 = vector.broadcast %86 : vector<1x128xf32> to vector<32x128xf32>
    %88 = arith.addf %85, %87 : vector<32x128xf32>
    %cst_49 = arith.constant 0.000000e+00 : f32
    %89 = vector.broadcast %cst_49 : f32 to vector<32x128xf32>
    %c0_i32 = arith.constant 0 : i32
    %90 = arith.truncf %89 : vector<32x128xf32> to vector<32x128xbf16>
    %cst_50 = arith.constant dense<0.000000e+00> : vector<64x128xf32>
    %91 = tpu.matmul %2, %90, %cst_50 {dimension_numbers = #tpu.dot_dimension_numbers<[1], [0], [0], [1], [0, 0, 1, 1], [], []>} : vector<64x32xbf16>, vector<32x128xbf16>, vector<64x128xf32> -> vector<64x128xf32>
    %92 = vector.extract_strided_slice %91 {offsets = [32, 0], sizes = [32, 128], strides = [1, 1]} : vector<64x128xf32> to vector<32x128xf32>
    %93 = vector.extract_strided_slice %92 {offsets = [0, 96], sizes = [32, 32], strides = [1, 1]} : vector<32x128xf32> to vector<32x32xf32>
    %94 = vector.extract_strided_slice %92 {offsets = [0, 0], sizes = [32, 96], strides = [1, 1]} : vector<32x128xf32> to vector<32x96xf32>
    %95 = tpu.concatenate %93, %94 in 1 : vector<32x32xf32>, vector<32x96xf32> -> vector<32x128xf32>
    %96 = vector.extract_strided_slice %91 {offsets = [0, 0], sizes = [32, 128], strides = [1, 1]} : vector<64x128xf32> to vector<32x128xf32>
    %97 = arith.addf %96, %95 : vector<32x128xf32>
    %c1024 = arith.constant 1024 : index
    %c0_51 = arith.constant 0 : index
    %98 = vector.load %arg6[%c1024, %c0_51] : memref<1792x128xbf16, #tpu.memory_space<vmem>>, vector<128x128xbf16>
    %99 = arith.truncf %97 : vector<32x128xf32> to vector<32x128xbf16>
    %cst_52 = arith.constant dense<0.000000e+00> : vector<32x128xf32>
    %100 = tpu.matmul %99, %98, %cst_52 {dimension_numbers = #tpu.dot_dimension_numbers<[1], [0], [0], [1], [0, 0, 1, 1], [], []>} : vector<32x128xbf16>, vector<128x128xbf16>, vector<32x128xf32> -> vector<32x128xf32>
    %101 = arith.addf %82, %100 : vector<32x128xf32>
    %cst_53 = arith.constant 0.000000e+00 : f32
    %102 = vector.broadcast %cst_53 : f32 to vector<32x128xf32>
    %103 = arith.maximumf %101, %102 : vector<32x128xf32>
    %104 = arith.truncf %103 : vector<32x128xf32> to vector<32x128xbf16>
    %cst_54 = arith.constant dense<0.000000e+00> : vector<32x128xf32>
    %105 = tpu.matmul %5, %104, %cst_54 {dimension_numbers = #tpu.dot_dimension_numbers<[1], [0], [0], [1], [0, 0, 1, 1], [], []>} : vector<32x32xbf16>, vector<32x128xbf16>, vector<32x128xf32> -> vector<32x128xf32>
    %c1280 = arith.constant 1280 : index
    %c0_55 = arith.constant 0 : index
    %106 = vector.load %arg6[%c1280, %c0_55] : memref<1792x128xbf16, #tpu.memory_space<vmem>>, vector<128x128xbf16>
    %107 = arith.truncf %105 : vector<32x128xf32> to vector<32x128xbf16>
    %cst_56 = arith.constant dense<0.000000e+00> : vector<32x128xf32>
    %108 = tpu.matmul %107, %106, %cst_56 {dimension_numbers = #tpu.dot_dimension_numbers<[1], [0], [0], [1], [0, 0, 1, 1], [], []>} : vector<32x128xbf16>, vector<128x128xbf16>, vector<32x128xf32> -> vector<32x128xf32>
    %109 = arith.addf %88, %108 : vector<32x128xf32>
    %cst_57 = arith.constant 0.000000e+00 : f32
    %110 = vector.broadcast %cst_57 : f32 to vector<32x128xf32>
    %111 = arith.maximumf %109, %110 : vector<32x128xf32>
    %112 = vector.broadcast %6 : vector<32x1xf32> to vector<32x128xf32>
    %113 = arith.mulf %112, %89 : vector<32x128xf32>
    %114 = arith.truncf %111 : vector<32x128xf32> to vector<32x128xbf16>
    %cst_58 = arith.constant dense<0.000000e+00> : vector<32x128xf32>
    %115 = tpu.matmul %4, %114, %cst_58 {dimension_numbers = #tpu.dot_dimension_numbers<[1], [0], [0], [1], [0, 0, 1, 1], [], []>} : vector<32x32xbf16>, vector<32x128xbf16>, vector<32x128xf32> -> vector<32x128xf32>
    %116 = arith.addf %113, %115 : vector<32x128xf32>
    %c1_i32 = arith.constant 1 : i32
    %117 = arith.truncf %116 : vector<32x128xf32> to vector<32x128xbf16>
    %cst_59 = arith.constant dense<0.000000e+00> : vector<64x128xf32>
    %118 = tpu.matmul %2, %117, %cst_59 {dimension_numbers = #tpu.dot_dimension_numbers<[1], [0], [0], [1], [0, 0, 1, 1], [], []>} : vector<64x32xbf16>, vector<32x128xbf16>, vector<64x128xf32> -> vector<64x128xf32>
    %119 = vector.extract_strided_slice %118 {offsets = [32, 0], sizes = [32, 128], strides = [1, 1]} : vector<64x128xf32> to vector<32x128xf32>
    %120 = vector.extract_strided_slice %119 {offsets = [0, 96], sizes = [32, 32], strides = [1, 1]} : vector<32x128xf32> to vector<32x32xf32>
    %121 = vector.extract_strided_slice %119 {offsets = [0, 0], sizes = [32, 96], strides = [1, 1]} : vector<32x128xf32> to vector<32x96xf32>
    %122 = tpu.concatenate %120, %121 in 1 : vector<32x32xf32>, vector<32x96xf32> -> vector<32x128xf32>
    %123 = vector.extract_strided_slice %118 {offsets = [0, 0], sizes = [32, 128], strides = [1, 1]} : vector<64x128xf32> to vector<32x128xf32>
    %124 = arith.addf %123, %122 : vector<32x128xf32>
    %c1024_60 = arith.constant 1024 : index
    %c0_61 = arith.constant 0 : index
    %125 = vector.load %arg6[%c1024_60, %c0_61] : memref<1792x128xbf16, #tpu.memory_space<vmem>>, vector<128x128xbf16>
    %126 = arith.truncf %124 : vector<32x128xf32> to vector<32x128xbf16>
    %cst_62 = arith.constant dense<0.000000e+00> : vector<32x128xf32>
    %127 = tpu.matmul %126, %125, %cst_62 {dimension_numbers = #tpu.dot_dimension_numbers<[1], [0], [0], [1], [0, 0, 1, 1], [], []>} : vector<32x128xbf16>, vector<128x128xbf16>, vector<32x128xf32> -> vector<32x128xf32>
    %128 = arith.addf %82, %127 : vector<32x128xf32>
    %cst_63 = arith.constant 0.000000e+00 : f32
    %129 = vector.broadcast %cst_63 : f32 to vector<32x128xf32>
    %130 = arith.maximumf %128, %129 : vector<32x128xf32>
    %131 = arith.truncf %130 : vector<32x128xf32> to vector<32x128xbf16>
    %cst_64 = arith.constant dense<0.000000e+00> : vector<32x128xf32>
    %132 = tpu.matmul %5, %131, %cst_64 {dimension_numbers = #tpu.dot_dimension_numbers<[1], [0], [0], [1], [0, 0, 1, 1], [], []>} : vector<32x32xbf16>, vector<32x128xbf16>, vector<32x128xf32> -> vector<32x128xf32>
    %c1280_65 = arith.constant 1280 : index
    %c0_66 = arith.constant 0 : index
    %133 = vector.load %arg6[%c1280_65, %c0_66] : memref<1792x128xbf16, #tpu.memory_space<vmem>>, vector<128x128xbf16>
    %134 = arith.truncf %132 : vector<32x128xf32> to vector<32x128xbf16>
    %cst_67 = arith.constant dense<0.000000e+00> : vector<32x128xf32>
    %135 = tpu.matmul %134, %133, %cst_67 {dimension_numbers = #tpu.dot_dimension_numbers<[1], [0], [0], [1], [0, 0, 1, 1], [], []>} : vector<32x128xbf16>, vector<128x128xbf16>, vector<32x128xf32> -> vector<32x128xf32>
    %136 = arith.addf %88, %135 : vector<32x128xf32>
    %cst_68 = arith.constant 0.000000e+00 : f32
    %137 = vector.broadcast %cst_68 : f32 to vector<32x128xf32>
    %138 = arith.maximumf %136, %137 : vector<32x128xf32>
    %139 = vector.broadcast %6 : vector<32x1xf32> to vector<32x128xf32>
    %140 = arith.mulf %139, %116 : vector<32x128xf32>
    %141 = arith.truncf %138 : vector<32x128xf32> to vector<32x128xbf16>
    %cst_69 = arith.constant dense<0.000000e+00> : vector<32x128xf32>
    %142 = tpu.matmul %4, %141, %cst_69 {dimension_numbers = #tpu.dot_dimension_numbers<[1], [0], [0], [1], [0, 0, 1, 1], [], []>} : vector<32x32xbf16>, vector<32x128xbf16>, vector<32x128xf32> -> vector<32x128xf32>
    %143 = arith.addf %140, %142 : vector<32x128xf32>
    %144 = arith.truncf %143 : vector<32x128xf32> to vector<32x128xbf16>
    %cst_70 = arith.constant dense<0.000000e+00> : vector<16x128xf32>
    %145 = tpu.matmul %3, %144, %cst_70 {dimension_numbers = #tpu.dot_dimension_numbers<[1], [0], [0], [1], [0, 0, 1, 1], [], []>} : vector<16x32xbf16>, vector<32x128xbf16>, vector<16x128xf32> -> vector<16x128xf32>
    %146 = tpu.concatenate %143, %145 in 0 : vector<32x128xf32>, vector<16x128xf32> -> vector<48x128xf32>
    %c1408 = arith.constant 1408 : index
    %c0_71 = arith.constant 0 : index
    %147 = vector.load %arg6[%c1408, %c0_71] : memref<1792x128xbf16, #tpu.memory_space<vmem>>, vector<128x128xbf16>
    %148 = arith.truncf %146 : vector<48x128xf32> to vector<48x128xbf16>
    %cst_72 = arith.constant dense<0.000000e+00> : vector<48x128xf32>
    %149 = tpu.matmul %148, %147, %cst_72 {dimension_numbers = #tpu.dot_dimension_numbers<[1], [0], [0], [1], [0, 0, 1, 1], [], []>} : vector<48x128xbf16>, vector<128x128xbf16>, vector<48x128xf32> -> vector<48x128xf32>
    %c8 = arith.constant 8 : index
    %c0_73 = arith.constant 0 : index
    %150 = vector.load %arg7[%c8, %c0_73] : memref<16x128xf32, #tpu.memory_space<vmem>>, vector<1x128xf32>
    %151 = vector.broadcast %150 : vector<1x128xf32> to vector<48x128xf32>
    %152 = arith.addf %149, %151 : vector<48x128xf32>
    %cst_74 = arith.constant 0.000000e+00 : f32
    %153 = vector.broadcast %cst_74 : f32 to vector<48x128xf32>
    %154 = arith.maximumf %152, %153 : vector<48x128xf32>
    %c1536 = arith.constant 1536 : index
    %c0_75 = arith.constant 0 : index
    %155 = vector.load %arg6[%c1536, %c0_75] : memref<1792x128xbf16, #tpu.memory_space<vmem>>, vector<128x128xbf16>
    %156 = arith.truncf %154 : vector<48x128xf32> to vector<48x128xbf16>
    %cst_76 = arith.constant dense<0.000000e+00> : vector<48x128xf32>
    %157 = tpu.matmul %156, %155, %cst_76 {dimension_numbers = #tpu.dot_dimension_numbers<[1], [0], [0], [1], [0, 0, 1, 1], [], []>} : vector<48x128xbf16>, vector<128x128xbf16>, vector<48x128xf32> -> vector<48x128xf32>
    %c9 = arith.constant 9 : index
    %c0_77 = arith.constant 0 : index
    %158 = vector.load %arg7[%c9, %c0_77] : memref<16x128xf32, #tpu.memory_space<vmem>>, vector<1x128xf32>
    %159 = vector.broadcast %158 : vector<1x128xf32> to vector<48x128xf32>
    %160 = arith.addf %157, %159 : vector<48x128xf32>
    %cst_78 = arith.constant 0.000000e+00 : f32
    %161 = vector.broadcast %cst_78 : f32 to vector<48x128xf32>
    %162 = arith.maximumf %160, %161 : vector<48x128xf32>
    %c1664 = arith.constant 1664 : index
    %c0_79 = arith.constant 0 : index
    %163 = vector.load %arg6[%c1664, %c0_79] : memref<1792x128xbf16, #tpu.memory_space<vmem>>, vector<128x128xbf16>
    %164 = arith.truncf %162 : vector<48x128xf32> to vector<48x128xbf16>
    %cst_80 = arith.constant dense<0.000000e+00> : vector<48x128xf32>
    %165 = tpu.matmul %164, %163, %cst_80 {dimension_numbers = #tpu.dot_dimension_numbers<[1], [0], [0], [1], [0, 0, 1, 1], [], []>} : vector<48x128xbf16>, vector<128x128xbf16>, vector<48x128xf32> -> vector<48x128xf32>
    %c10 = arith.constant 10 : index
    %c0_81 = arith.constant 0 : index
    %166 = vector.load %arg7[%c10, %c0_81] : memref<16x128xf32, #tpu.memory_space<vmem>>, vector<1x128xf32>
    %167 = vector.broadcast %166 : vector<1x128xf32> to vector<48x128xf32>
    %168 = arith.addf %165, %167 : vector<48x128xf32>
    %c0_82 = arith.constant 0 : index
    %c0_83 = arith.constant 0 : index
    %169 = vector.load %arg8[%c0_82, %c0_83] : memref<48x128xf32, #tpu.memory_space<vmem>>, vector<48x128xf32>
    tpu.vector_store %arg8[%c0_82, %c0_83], %168 {strides = array<i32>} : memref<48x128xf32, #tpu.memory_space<vmem>>, vector<48x128xf32>,
    return
  }
}

</mosaic_0001>

<bundles_post_ra>
// kernel: tpu_custom_call.1
= control target key start
LH: loop header
LB: loop body
LE: loop exit
PB: predicated region body
PF: predicated region fallthrough
CT: control target
= control target key end

     0   :  { %13 = vsyncpa [#allocation3], 0  ;;  %s3068_s0 = inlined_call_operand.vmem [shape: bf16[32,128], index: 0, kind: input, shape index: {}]   ;;  %s3069_s1 = inlined_call_operand.vmem [shape: bf16[32,128], index: 1, kind: input, shape index: {}]   ;;  %s3070_s2 = inlined_call_operand.vmem [shape: bf16[112,32], index: 2, kind: input, shape index: {}]   ;;  %s3071_s3 = inlined_call_operand.vmem [shape: bf16[32,32], index: 3, kind: input, shape index: {}]   ;;  %s3072_s4 = inlined_call_operand.vmem [shape: bf16[32,32], index: 4, kind: input, shape index: {}]   ;;  %s3073_s5 = inlined_call_operand.vmem [shape: f32[32,1], index: 5, kind: input, shape index: {}]   ;;  %s3074_s6 = inlined_call_operand.hbm [shape: bf16[1792,128], index: 6, kind: input, shape index: {}]   ;;  %s3075_s7 = inlined_call_operand.vmem [shape: f32[16,128], index: 7, kind: input, shape index: {}]   ;;  %s3076_s8 = inlined_call_operand.hbm [shape: f32[48,128], index: 8, kind: output, shape index: {}]  }
   0x1   :  { %14 = vsyncpa [#allocation4], 0  ;;  %s31_s29 = sshll.u32 %s3074_s6, 4  ;;  %s2675_s30 = smov [#allocation2]   ;;  %s32_s29 = int_to_ptr.hbm [resolvable:$true] %s31_s29 }
   0x2   :  { %s33_s9 = sshll.u32 %s2675_s30, 4  ;;  %s2676_s10 = smov 64   ;;  %s34_s9 = int_to_ptr.vmem [resolvable:$true] %s33_s9 }
   0x3   :  { %s2677_s11 = smov 4  }
   0x4   :  { %39 = dma.hbm_to_vmem [thread:$0]  %s32_s29, 14336, %s34_s9, [#allocation3], %s2676_s10, %s2676_s10, %s2677_s11  }
   0x5   :  { %2671 = dma.done.wait [#allocation3], 14336  }
   0x6   :  { %2672 = vsyncadd [#allocation3], 4294952960  ;;  %v2456_v0 = vld [vmem:[%s3068_s0 + $0x8] sm:$0xff]  ;;  %v2455_v1 = vld [vmem:[%s3068_s0] sm:$0xff]  ;;  %vm99_vm0 = vcmask 261120   ;;  %v372_v38 = vlaneseq  ;;  %s2679_s16 = smov 32  }
   0x7   :  { %112 = vmatpush.bf16.msra.mxu0 %v2456_v0  ;;  %163 = vmatpush.bf16.msra.mxu1 %v2456_v0  ;;  %v2475_v2 = vld [vmem:[#allocation2 + $0x38] sm:$0xff]  ;;  %v2457_v3 = vld [vmem:[%s3070_s2] sm:$0xff]  ;;  %v2743_v4 = vld [vmem:[%s3070_s2 + $0x10] sm:$0xff]  ;;  %s1911_s27 = sshll.u32 %s3076_s8, 4  ;;  %s2681_s28 = smov 128   ;;  %s1912_s27 = int_to_ptr.hbm [resolvable:$true] %s1911_s27 }
   0x8   :  { %v2474_v5 = vld [vmem:[#allocation2 + $0x30] sm:$0xff]  ;;  %v2473_v6 = vld [vmem:[#allocation2 + $0x28] sm:$0xff]  ;;  %v2472_v7 = vld [vmem:[#allocation2 + $0x20] sm:$0xff]  ;;  %v373_v42 = vand.u32 127, %v372_v38  ;;  %s2682_s29 = smov 8  }
   0x9   :  { %v2471_v8 = vld [vmem:[#allocation2 + $0x18] sm:$0xff]  ;;  %v2458_v9 = vld [vmem:[%s3070_s2 + $0x8] sm:$0xff]  ;;  %v2762_v11 = vld [vmem:[%s3070_s2 + $0x20] sm:$0xff] }
   0xa   :  { %v2754_v10 = vld [vmem:[%s3070_s2 + $0x18] sm:$0xff]  ;;  %v2470_v12 = vld [vmem:[#allocation2 + $0x10] sm:$0xff]  ;;  %v2769_v13 = vld [vmem:[%s3070_s2 + $0x28] sm:$0xff]  ;;  %vm374_vm1 = vcmp.ge.s32.totalorder %v373_v42, 10  ;;  %vm375_vm2 = vcmp.lt.s32.totalorder %v373_v42, 13 }
   0xb   :  { %113 = vmatpush.bf16.msra.mxu0 %v2455_v1  ;;  %164 = vmatpush.bf16.msra.mxu1 %v2455_v1  ;;  %v2469_v14 = vld [vmem:[#allocation2 + $0x8] sm:$0xff]  ;;  %v2468_v15 = vld [vmem:[#allocation2] sm:$0xff]  ;;  %v2491_v16 = vld [vmem:[#allocation2 + $0xb8] sm:$0xff] }
   0xc   :  { %v2499_v17 = vld [vmem:[#allocation2 + $0xf8] sm:$0xff]  ;;  %592 = vmatpush.bf16.msra.mxu2 %v2491_v16  ;;  %v2490_v18 = vld [vmem:[#allocation2 + $0xb0] sm:$0xff]  ;;  %v2489_v21 = vld [vmem:[#allocation2 + $0xa8] sm:$0xff] }
   0xd   :  { %v2498_v22 = vld [vmem:[#allocation2 + $0xf0] sm:$0xff]  ;;  %v2497_v23 = vld [vmem:[#allocation2 + $0xe8] sm:$0xff]  ;;  %v2488_v24 = vld [vmem:[#allocation2 + $0xa0] sm:$0xff] }
   0xe   :  { %1940 = vmatmul.msk.bf16.vlgmr.msra.gmra.mxu0 %vm99_vm0, %v2457_v3  ;;  %1958 = vmatmul.msk.bf16.vlgmr.msra.gmra.mxu1 %vm99_vm0, %v2743_v4  ;;  %v2483_v25 = vld [vmem:[#allocation2 + $0x78] sm:$0xff]  ;;  %v2496_v30 = vld [vmem:[#allocation2 + $0xe0] sm:$0xff]  ;;  %v2482_v31 = vld [vmem:[#allocation2 + $0x70] sm:$0xff] }
   0xf   :  { %254 = vmatpush.bf16.msrb.mxu0 %v2475_v2  ;;  %345 = vmatpush.bf16.msra.mxu3 %v2483_v25  ;;  %v2487_v29 = vld [vmem:[#allocation2 + $0x98] sm:$0xff]  ;;  %v2486_v33 = vld [vmem:[#allocation2 + $0x90] sm:$0xff]  ;;  %v2481_v34 = vld [vmem:[#allocation2 + $0x68] sm:$0xff] }
  0x10   :  { %593 = vmatpush.bf16.msra.mxu2 %v2490_v18  ;;  %v2495_v32 = vld [vmem:[#allocation2 + $0xd8] sm:$0xff]  ;;  %v2485_v37 = vld [vmem:[#allocation2 + $0x88] sm:$0xff]  ;;  %vm2773_vm3 = vmand %vm374_vm1, %vm375_vm2 }
  0x11   :  { %v2494_v52 = vld [vmem:[#allocation2 + $0xd0] sm:$0xff]  ;;  %v2480_v53 = vld [vmem:[#allocation2 + $0x60] sm:$0xff]  ;;  %v2493_v55 = vld [vmem:[#allocation2 + $0xc8] sm:$0xff] }
  0x12   :  { %v2484_v54 = vld [vmem:[#allocation2 + $0x80] sm:$0xff]  ;;  %v2479_v61 = vld [vmem:[#allocation2 + $0x58] sm:$0xff]  ;;  %v2478_v2 = vld [vmem:[#allocation2 + $0x50] sm:$0xff] }
  0x13   :  { %255 = vmatpush.bf16.msrb.mxu0 %v2474_v5  ;;  %346 = vmatpush.bf16.msra.mxu3 %v2482_v31  ;;  %v2492_v62 = vld [vmem:[#allocation2 + $0xc0] sm:$0xff]  ;;  %v2541_v38 = vld [vmem:[#allocation2 + $0x278] sm:$0xff]  ;;  %v2535_v44 = vld [vmem:[#allocation2 + $0x248] sm:$0xff] }
  0x14   :  { %594 = vmatpush.bf16.msra.mxu2 %v2489_v21  ;;  %v2506_v16 = vld [vmem:[#allocation2 + $0x120] sm:$0xff]  ;;  %v2503_v21 = vld [vmem:[#allocation2 + $0x108] sm:$0xff]  ;;  %v2537_v42 = vld [vmem:[#allocation2 + $0x258] sm:$0xff] }
  0x17   :  { %256 = vmatpush.bf16.msrb.mxu0 %v2473_v6  ;;  %347 = vmatpush.bf16.msra.mxu3 %v2481_v34  ;;  %v2477_v6 = vld [vmem:[#allocation2 + $0x48] sm:$0xff] }
  0x18   :  { %595 = vmatpush.bf16.msra.mxu2 %v2488_v24  ;;  %v2502_v24 = vld [vmem:[#allocation2 + $0x100] sm:$0xff] }
  0x1b   :  { %257 = vmatpush.bf16.msrb.mxu0 %v2472_v7  ;;  %348 = vmatpush.bf16.msra.mxu3 %v2480_v53  ;;  %v2476_v7 = vld [vmem:[#allocation2 + $0x40] sm:$0xff]  ;;  %v2513_v53 = vld [vmem:[#allocation2 + $0x158] sm:$0xff] }
  0x1c   :  { %596 = vmatpush.bf16.msra.mxu2 %v2487_v29 }
  0x1e   :  { %1941 = vmatmul.msk.bf16.gmra.mxu0 %vm99_vm0, %v2458_v9  ;;  %1959 = vmatmul.msk.bf16.gmra.mxu1 %vm99_vm0, %v2754_v10  ;;  %v2509_v9 = vld [vmem:[#allocation2 + $0x138] sm:$0xff] }
  0x1f   :  { %258 = vmatpush.bf16.msrb.mxu0 %v2471_v8  ;;  %349 = vmatpush.bf16.msra.mxu3 %v2479_v61 }
  0x20   :  { %597 = vmatpush.bf16.msra.mxu2 %v2486_v33 }
  0x23   :  { %259 = vmatpush.bf16.msrb.mxu0 %v2470_v12  ;;  %350 = vmatpush.bf16.msra.mxu3 %v2478_v2  ;;  %v2508_v12 = vld [vmem:[#allocation2 + $0x130] sm:$0xff] }
  0x24   :  { %598 = vmatpush.bf16.msra.mxu2 %v2485_v37  ;;  %v2501_v37 = vld [vmem:[%s3069_s1 + $0x8] sm:$0xff] }
  0x27   :  { %260 = vmatpush.bf16.msrb.mxu0 %v2469_v14  ;;  %351 = vmatpush.bf16.msra.mxu3 %v2477_v6 }
  0x28   :  { %599 = vmatpush.bf16.msra.mxu2 %v2484_v54  ;;  %v2601_v54 = vld [vmem:[%s3075_s7 + $0x1] ss:$0 sm:$0xff] }
  0x2b   :  { %261 = vmatpush.bf16.msrb.mxu0 %v2468_v15  ;;  %352 = vmatpush.bf16.msra.mxu3 %v2476_v7  ;;  %v2507_v15 = vld [vmem:[#allocation2 + $0x128] sm:$0xff] }
  0x2e   :  { %1960 = vmatmul.msk.bf16.gmra.mxu1 %vm99_vm0, %v2762_v11 }
  0x2f   :  { %525 = vmatpush.bf16.msra.mxu0 %v2499_v17  ;;  %691 = vmatpush.bf16.msrb.mxu3 %v2509_v9  ;;  %v2505_v17 = vld [vmem:[#allocation2 + $0x118] sm:$0xff] }
  0x33   :  { %526 = vmatpush.bf16.msra.mxu0 %v2498_v22  ;;  %692 = vmatpush.bf16.msrb.mxu3 %v2508_v12 }
  0x37   :  { %527 = vmatpush.bf16.msra.mxu0 %v2497_v23  ;;  %693 = vmatpush.bf16.msrb.mxu3 %v2507_v15 }
  0x3b   :  { %528 = vmatpush.bf16.msra.mxu0 %v2496_v30  ;;  %694 = vmatpush.bf16.msrb.mxu3 %v2506_v16 }
  0x3e   :  { %1961 = vmatmul.msk.bf16.gmra.mxu1 %vm99_vm0, %v2769_v13 }
  0x3f   :  { %529 = vmatpush.bf16.msra.mxu0 %v2495_v32  ;;  %695 = vmatpush.bf16.msrb.mxu3 %v2505_v17 }
  0x43   :  { %530 = vmatpush.bf16.msra.mxu0 %v2494_v52 }
  0x47   :  { %531 = vmatpush.bf16.msra.mxu0 %v2493_v55 }
  0x4b   :  { %532 = vmatpush.bf16.msra.mxu0 %v2492_v62 }
  0x8b   :  { %v115_v19 = vpop.f32.mrf.mxu0  ;;  %v166_v20 = vpop.f32.mrf.mxu1 }
  0x93   :  { %v117_v26 = vpop.f32.mrf.mxu0  ;;  %v168_v27 = vpop.f32.mrf.mxu1 }
  0x94   :  { %v202_v28 = vpack.c.bf16 %v117_v26, %v115_v19  ;;  %v457_v56 = vpack.c.bf16 %v168_v27, %v166_v20  ;;  %v2504_v19 = vld [vmem:[#allocation2 + $0x110] sm:$0xff] }
  0x95   :  { %696 = vmatpush.bf16.msrb.mxu3 %v2504_v19 }
  0x96   :  { %262 = vmatmul.bf16.vlgmr.msrb.gmra.mxu0 %v202_v28  ;;  %600 = vmatmul.bf16.vlgmr.msra.gmra.mxu2 %v457_v56 }
  0x99   :  { %697 = vmatpush.bf16.msrb.mxu3 %v2503_v21 }
  0x9b   :  { %v120_v35 = vpop.f32.mrf.mxu0  ;;  %v171_v36 = vpop.f32.mrf.mxu1 }
  0x9d   :  { %698 = vmatpush.bf16.msrb.mxu3 %v2502_v24 }
  0xa3   :  { %v122_v39 = vpop.f32.mrf.mxu0  ;;  %v173_v40 = vpop.f32.mrf.mxu1 }
  0xa4   :  { %v203_v41 = vpack.c.bf16 %v122_v39, %v120_v35  ;;  %v458_v8 = vpack.c.bf16 %v173_v40, %v171_v36  ;;  %v2540_v39 = vld [vmem:[#allocation2 + $0x270] sm:$0xff] }
  0xa6   :  { %267 = vmatmul.bf16.gmra.mxu0 %v203_v41  ;;  %605 = vmatmul.bf16.gmra.mxu2 %v458_v8  ;;  %v2538_v41 = vld [vmem:[#allocation2 + $0x260] sm:$0xff] }
  0xa7   :  { %v2510_v8 = vld [vmem:[#allocation2 + $0x140] sm:$0xff] }
  0xab   :  { %v176_v43 = vpop.f32.mrf.mxu1 }
  0xac   :  { %v368_v45 = vsub.f32 %v166_v20, %v176_v43  ;;  %v2600_v20 = vld [vmem:[%s3075_s7] ss:$0 sm:$0xff] }
  0xae   :  { %v377_v46 = vsel %vm2773_vm3, %v368_v45, 0.0  ;;  %v2534_v45 = vld [vmem:[#allocation2 + $0x240] sm:$0xff] }
  0xaf   :  { %v381_v47 = vmul.f32 %v377_v46, %v377_v46  ;;  %v2517_v46 = vld [vmem:[#allocation2 + $0x178] sm:$0xff] }
  0xb0   :  { %802 = vmatpush.bf16.msrb.mxu0 %v2517_v46 }
  0xb1   :  { %385 = vadd.xlane.f32.xlu0 %v381_v47 }
  0xb3   :  { %v178_v48 = vpop.f32.mrf.mxu1 }
  0xb4   :  { %v369_v49 = vsub.f32 %v168_v27, %v178_v48  ;;  %v475_v63 = vpack.c.bf16 %v178_v48, %v176_v43  ;;  %v2536_v43 = vld [vmem:[#allocation2 + $0x250] sm:$0xff] }
  0xb5   :  { %v2516_v48 = vld [vmem:[#allocation2 + $0x170] sm:$0xff] }
  0xb6   :  { %v378_v50 = vsel %vm2773_vm3, %v369_v49, 0.0  ;;  %533 = vmatmul.bf16.vlgmr.msra.gmra.mxu0 %v475_v63  ;;  %v2515_v49 = vld [vmem:[#allocation2 + $0x168] sm:$0xff] }
  0xb7   :  { %v382_v51 = vmul.f32 %v378_v50, %v378_v50  ;;  %803 = vmatpush.bf16.msrb.mxu0 %v2516_v48 }
  0xb9   :  { %387 = vadd.xlane.f32.xlu0 %v382_v51  ;;  %v2514_v51 = vld [vmem:[#allocation2 + $0x160] sm:$0xff] }
  0xbb   :  { %v181_v57 = vpop.f32.mrf.mxu1  ;;  %804 = vmatpush.bf16.msrb.mxu0 %v2515_v49  ;;  %v2678_v49 = vmov 0  }
  0xbc   :  { %v370_v58 = vsub.f32 %v171_v36, %v181_v57  ;;  %v2500_v36 = vld [vmem:[%s3069_s1] sm:$0xff]  ;;  %2599 = vset.pattern.permute.xlu0 %v2678_v49  ;;  %2598 = vset.pattern.permute.xlu2 %v2678_v49 }
  0xbe   :  { %v379_v59 = vsel %vm2773_vm3, %v370_v58, 0.0 }
  0xbf   :  { %v383_v60 = vmul.f32 %v379_v59, %v379_v59  ;;  %805 = vmatpush.bf16.msrb.mxu0 %v2514_v51 }
  0xc1   :  { %389 = vadd.xlane.f32.xlu1 %v383_v60 }
  0xc3   :  { %v183_v0 = vpop.f32.mrf.mxu1  ;;  %806 = vmatpush.bf16.msrb.mxu0 %v2513_v53 }
  0xc4   :  { %v371_v1 = vsub.f32 %v173_v40, %v183_v0  ;;  %v476_v14 = vpack.c.bf16 %v183_v0, %v181_v57  ;;  %v2539_v40 = vld [vmem:[#allocation2 + $0x268] sm:$0xff]  ;;  %v2512_v57 = vld [vmem:[#allocation2 + $0x150] sm:$0xff] }
  0xc5   :  { %v2511_v0 = vld [vmem:[#allocation2 + $0x148] sm:$0xff] }
  0xc6   :  { %v380_v3 = vsel %vm2773_vm3, %v371_v1, 0.0  ;;  %538 = vmatmul.bf16.gmra.mxu0 %v476_v14 }
  0xc7   :  { %v384_v5 = vmul.f32 %v380_v3, %v380_v3  ;;  %807 = vmatpush.bf16.msrb.mxu0 %v2512_v57  ;;  %v2603_v57 = vld [vmem:[%s3075_s7 + $0x2] ss:$0 sm:$0xff] }
  0xc9   :  { %391 = vadd.xlane.f32.xlu1 %v384_v5 }
  0xcb   :  { %808 = vmatpush.bf16.msrb.mxu0 %v2511_v0 }
  0xcf   :  { %809 = vmatpush.bf16.msrb.mxu0 %v2510_v8 }
  0xd3   :  { %1097 = vmatpush.bf16.msra.mxu0 %v2678_v49 }
 0x113   :  { %v263_v18 = vpop.f32.mrf.mxu0 }
 0x114   :  { %v264_v22 = vadd.f32 %v2600_v20, %v263_v18 }
 0x116   :  { %v273_v26 = vmax.f32 %v264_v22, 0.0 }
 0x119   :  { %v601_v17 = vpop.f32.mrf.mxu2 }
 0x11b   :  { %v265_v23 = vpop.f32.mrf.mxu0 }
 0x11c   :  { %v266_v25 = vadd.f32 %v2600_v20, %v265_v23 }
 0x11e   :  { %v274_v27 = vmax.f32 %v266_v25, 0.0 }
 0x120   :  { %v293_v28 = vpack.c.bf16 %v274_v27, %v273_v26 }
 0x122   :  { %353 = vmatmul.bf16.vlgmr.msra.gmra.mxu3 %v293_v28 }
 0x123   :  { %v268_v29 = vpop.f32.mrf.mxu0  ;;  %1071 = vmatpush.bf16.msra.mxu3 %v2541_v38 }
 0x124   :  { %v269_v30 = vadd.f32 %v2600_v20, %v268_v29  ;;  %v2794_v47 = vpop.xlane.xlu0 %385 }
 0x125   :  { %2611 = vrsqrt.f32 %v2794_v47  ;;  %vm400_vm4 = vcmp.eq.f32.partialorder %v2794_v47, inf  ;;  %vm402_vm5 = vcmp.eq.f32.partialorder %v2794_v47, 0.0 }
 0x126   :  { %v275_v33 = vmax.f32 %v269_v30, 0.0 }
 0x127   :  { %1072 = vmatpush.bf16.msra.mxu3 %v2540_v39 }
 0x12b   :  { %v270_v31 = vpop.f32.mrf.mxu0  ;;  %1073 = vmatpush.bf16.msra.mxu3 %v2539_v40  ;;  %v2612_v55 = vpop.eup %2611 }
 0x12c   :  { %v271_v32 = vadd.f32 %v2600_v20, %v270_v31  ;;  %v2797_v50 = vpop.xlane.xlu0 %387  ;;  %v394_v59 = vmul.f32 %v2612_v55, %v2794_v47 }
 0x12d   :  { %2613 = vrsqrt.f32 %v2797_v50  ;;  %vm412_vm6 = vcmp.eq.f32.partialorder %v2797_v50, inf  ;;  %vm414_vm7 = vcmp.eq.f32.partialorder %v2797_v50, 0.0 }
 0x12e   :  { %v276_v34 = vmax.f32 %v271_v32, 0.0  ;;  %v395_v3 = vmul.f32 %v2612_v55, %v394_v59 }
 0x12f   :  { %1074 = vmatpush.bf16.msra.mxu3 %v2538_v41 }
 0x130   :  { %v294_v35 = vpack.c.bf16 %v276_v34, %v275_v33  ;;  %v396_v9 = vmul.f32 0.5, %v395_v3  ;;  %v403_v33 = vand.u32 2147483648, %v2794_v47 }
 0x132   :  { %358 = vmatmul.bf16.gmra.mxu3 %v294_v35  ;;  %v397_v15 = vsub.f32 1.5, %v396_v9 }
 0x133   :  { %1075 = vmatpush.bf16.msra.mxu3 %v2537_v42  ;;  %v2614_v58 = vpop.eup %2613  ;;  %v534_v18 = vpop.f32.mrf.mxu0  ;;  %v2602_v42 = vld [vmem:[%s3075_s7 + $0x3] ss:$0 sm:$0xff] }
 0x134   :  { %v2803_v56 = vpop.xlane.xlu1 %389  ;;  %v406_v63 = vmul.f32 %v2614_v58, %v2797_v50  ;;  %v398_v23 = vmul.f32 %v2612_v55, %v397_v15  ;;  %v602_v41 = vadd.f32 %v601_v17, %v534_v18 }
 0x135   :  { %2615 = vrsqrt.f32 %v2803_v56  ;;  %vm424_vm8 = vcmp.eq.f32.partialorder %v2803_v56, inf  ;;  %vm426_vm9 = vcmp.eq.f32.partialorder %v2803_v56, 0.0 }
 0x136   :  { %v407_v7 = vmul.f32 %v2614_v58, %v406_v63  ;;  %v399_v30 = vmul.f32 %v398_v23, %v2794_v47 }
 0x137   :  { %1076 = vmatpush.bf16.msra.mxu3 %v2536_v43 }
 0x138   :  { %v408_v14 = vmul.f32 0.5, %v407_v7 }
 0x13a   :  { %v409_v19 = vsub.f32 1.5, %v408_v14 }
 0x13b   :  { %1077 = vmatpush.bf16.msra.mxu3 %v2535_v44  ;;  %v2616_v16 = vpop.eup %2615  ;;  %v536_v39 = vpop.f32.mrf.mxu0 }
 0x13c   :  { %v2808_v6 = vpop.xlane.xlu1 %391  ;;  %v418_v21 = vmul.f32 %v2616_v16, %v2803_v56  ;;  %v410_v27 = vmul.f32 %v2614_v58, %v409_v19 }
 0x13d   :  { %2617 = vrsqrt.f32 %v2808_v6  ;;  %vm436_vm10 = vcmp.eq.f32.partialorder %v2808_v6, inf  ;;  %v439_v18 = vand.u32 2147483648, %v2808_v6  ;;  %vm438_vm11 = vcmp.eq.f32.partialorder %v2808_v6, 0.0 }
 0x13e   :  { %v419_v31 = vmul.f32 %v2616_v16, %v418_v21  ;;  %v411_v34 = vmul.f32 %v410_v27, %v2797_v50 }
 0x13f   :  { %1078 = vmatpush.bf16.msra.mxu3 %v2534_v45  ;;  %v415_v45 = vand.u32 2147483648, %v2797_v50 }
 0x140   :  { %v420_v38 = vmul.f32 0.5, %v419_v31  ;;  %v413_v44 = vsel %vm412_vm6, %v2797_v50, %v411_v34 }
 0x142   :  { %699 = vmatmul.bf16.vlgmr.msrb.gmra.mxu3 %v2500_v36  ;;  %v603_v36 = vpop.f32.mrf.mxu2 }
 0x143   :  { %v2618_v20 = vpop.eup %2617 }
 0x144   :  { %v430_v26 = vmul.f32 %v2618_v20, %v2808_v6 }
 0x146   :  { %v431_v35 = vmul.f32 %v2618_v20, %v430_v26 }
 0x148   :  { %v432_v46 = vmul.f32 0.5, %v431_v35  ;;  %v2524_v35 = vld [vmem:[#allocation2 + $0x1b0] sm:$0xff] }
 0x14a   :  { %v433_v53 = vsub.f32 1.5, %v432_v46  ;;  %v606_v50 = vpop.f32.mrf.mxu2 }
 0x14c   :  { %v434_v63 = vmul.f32 %v2618_v20, %v433_v53 }
 0x14e   :  { %v435_v7 = vmul.f32 %v434_v63, %v2808_v6  ;;  %v2530_v63 = vld [vmem:[#allocation2 + $0x1e0] sm:$0xff] }
 0x150   :  { %v437_v20 = vsel %vm436_vm10, %v2808_v6, %v435_v7  ;;  %v2525_v6 = vld [vmem:[#allocation2 + $0x1b8] sm:$0xff]  ;;  %v2528_v7 = vld [vmem:[#allocation2 + $0x1d0] sm:$0xff] }
 0x151   :  { %893 = vmatpush.bf16.msrb.mxu1 %v2525_v6 }
 0x152   :  { %704 = vmatmul.bf16.gmra.mxu3 %v2501_v37  ;;  %v401_v37 = vsel %vm400_vm4, %v2794_v47, %v399_v30  ;;  %v421_v47 = vsub.f32 1.5, %v420_v38  ;;  %v2521_v38 = vld [vmem:[#allocation2 + $0x198] sm:$0xff] }
 0x153   :  { %v404_v43 = vsel %vm402_vm5, %v403_v33, %v401_v37  ;;  %v2522_v37 = vld [vmem:[#allocation2 + $0x1a0] sm:$0xff] }
 0x154   :  { %v716_v51 = vmul.f32 %v2602_v42, %v404_v43  ;;  %v422_v58 = vmul.f32 %v2616_v16, %v421_v47 }
 0x155   :  { %894 = vmatpush.bf16.msrb.mxu1 %v2524_v35 }
 0x1a5   :  { %v354_v52 = vpop.f32.mrf.mxu3 }
 0x1a6   :  { %v355_v60 = vadd.f32 %v2601_v54, %v354_v52  ;;  %v416_v52 = vsel %vm414_vm7, %v415_v45, %v413_v44 }
 0x1a8   :  { %v364_v1 = vmax.f32 %v355_v60, 0.0 }
 0x1ad   :  { %v356_v61 = vpop.f32.mrf.mxu3 }
 0x1ae   :  { %v357_v62 = vadd.f32 %v2601_v54, %v356_v61  ;;  %v717_v61 = vmul.f32 %v2602_v42, %v416_v52 }
 0x1b0   :  { %v365_v2 = vmax.f32 %v357_v62, 0.0  ;;  %v539_v62 = vpop.f32.mrf.mxu0 }
 0x1b1   :  { %v607_v15 = vadd.f32 %v606_v50, %v539_v62  ;;  %v2531_v62 = vld [vmem:[#allocation2 + $0x1e8] sm:$0xff] }
 0x1b2   :  { %v1019_v5 = vpack.c.bf16 %v365_v2, %v364_v1  ;;  %v423_v2 = vmul.f32 %v422_v58, %v2803_v56 }
 0x1b4   :  { %1079 = vmatmul.bf16.vlgmr.msra.gmra.mxu3 %v1019_v5  ;;  %v427_v5 = vand.u32 2147483648, %v2803_v56 }
 0x1b5   :  { %v359_v12 = vpop.f32.mrf.mxu3 }
 0x1b6   :  { %v360_v22 = vadd.f32 %v2601_v54, %v359_v12  ;;  %v425_v12 = vsel %vm424_vm8, %v2803_v56, %v423_v2 }
 0x1b7   :  { %v428_v17 = vsel %vm426_vm9, %v427_v5, %v425_v12  ;;  %v2861_v5 = vld [vmem:[#allocation2 + $0x230] sm:$0xff]  ;;  %v2867_v12 = vld [vmem:[#allocation2 + $0x220] sm:$0xff] }
 0x1b8   :  { %v366_v28 = vmax.f32 %v360_v22, 0.0  ;;  %v541_v21 = vpop.f32.mrf.mxu0  ;;  %v608_v22 = vpop.f32.mrf.mxu2  ;;  %v718_v23 = vmul.f32 %v2602_v42, %v428_v17  ;;  %v2876_v17 = vld [vmem:[#allocation2 + $0x208] sm:$0xff] }
 0x1bd   :  { %v361_v24 = vpop.f32.mrf.mxu3 }
 0x1be   :  { %v362_v25 = vadd.f32 %v2601_v54, %v361_v24  ;;  %v604_v54 = vadd.f32 %v603_v36, %v536_v39  ;;  %v440_v24 = vsel %vm438_vm11, %v439_v18, %v437_v20  ;;  %v2523_v36 = vld [vmem:[#allocation2 + $0x1a8] sm:$0xff]  ;;  %v2879_v18 = vld [vmem:[#allocation2 + $0x200] sm:$0xff] }
 0x1bf   :  { %895 = vmatpush.bf16.msrb.mxu1 %v2523_v36  ;;  %v2519_v39 = vld [vmem:[#allocation2 + $0x188] sm:$0xff]  ;;  %v2606_v20 = vld [vmem:[%s3075_s7 + $0x5] ss:$0 sm:$0xff] }
 0x1c0   :  { %v367_v29 = vmax.f32 %v362_v25, 0.0  ;;  %v609_v25 = vadd.f32 %v608_v22, %v541_v21 }
 0x1c2   :  { %v1020_v32 = vpack.c.bf16 %v367_v29, %v366_v28  ;;  %v719_v28 = vmul.f32 %v2602_v42, %v440_v24 }
 0x1c3   :  { %896 = vmatpush.bf16.msrb.mxu1 %v2522_v37 }
 0x1c4   :  { %1084 = vmatmul.bf16.gmra.mxu3 %v1020_v32 }
 0x1c5   :  { %v700_v40 = vpop.f32.mrf.mxu3 }
 0x1c6   :  { %v710_v48 = vadd.f32 %v700_v40, %v602_v41  ;;  %v2605_v40 = vld [vmem:[%s3075_s7 + $0x4] ss:$0 sm:$0xff] }
 0x1c7   :  { %897 = vmatpush.bf16.msrb.mxu1 %v2521_v38 }
 0x1c8   :  { %v720_v55 = vadd.f32 %v716_v51, %v710_v48 }
 0x1ca   :  { %v726_v0 = vadd.f32 %v2603_v57, %v720_v55 }
 0x1cc   :  { %v730_v8 = vmax.f32 %v726_v0, 0.0 }
 0x1cd   :  { %v702_v59 = vpop.f32.mrf.mxu3 }
 0x1ce   :  { %v711_v60 = vadd.f32 %v702_v59, %v604_v54  ;;  %v2533_v59 = vld [vmem:[#allocation2 + $0x1f8] sm:$0xff] }
 0x1cf   :  { %984 = vmatpush.bf16.msrb.mxu2 %v2533_v59 }
 0x1d0   :  { %v721_v1 = vadd.f32 %v717_v61, %v711_v60  ;;  %v2854_v60 = vld [vmem:[#allocation2 + $0x238] sm:$0xff]  ;;  %v2532_v61 = vld [vmem:[#allocation2 + $0x1f0] sm:$0xff] }
 0x1d2   :  { %v727_v3 = vadd.f32 %v2603_v57, %v721_v1 }
 0x1d3   :  { %985 = vmatpush.bf16.msrb.mxu2 %v2532_v61 }
 0x1d4   :  { %v731_v9 = vmax.f32 %v727_v3, 0.0  ;;  %v2529_v3 = vld [vmem:[#allocation2 + $0x1d8] sm:$0xff] }
 0x1d5   :  { %v705_v14 = vpop.f32.mrf.mxu3 }
 0x1d6   :  { %v750_v16 = vpack.c.bf16 %v731_v9, %v730_v8  ;;  %v712_v19 = vadd.f32 %v705_v14, %v607_v15  ;;  %v2864_v8 = vld [vmem:[#allocation2 + $0x228] sm:$0xff]  ;;  %v2526_v14 = vld [vmem:[#allocation2 + $0x1c0] sm:$0xff]  ;;  %v2870_v15 = vld [vmem:[#allocation2 + $0x218] sm:$0xff] }
 0x1d7   :  { %986 = vmatpush.bf16.msrb.mxu2 %v2531_v62  ;;  %v2527_v9 = vld [vmem:[#allocation2 + $0x1c8] sm:$0xff] }
 0x1d8   :  { %810 = vmatmul.bf16.vlgmr.msrb.gmra.mxu0 %v750_v16  ;;  %v722_v56 = vadd.f32 %v718_v23, %v712_v19  ;;  %v2873_v16 = vld [vmem:[#allocation2 + $0x210] sm:$0xff]  ;;  %v2908_v62 = vld [vmem:[#allocation2 + $0x2a8] sm:$0xff] }
 0x1da   :  { %v728_v30 = vadd.f32 %v2603_v57, %v722_v56 }
 0x1db   :  { %987 = vmatpush.bf16.msrb.mxu2 %v2530_v63 }
 0x1dc   :  { %v732_v32 = vmax.f32 %v728_v30, 0.0 }
 0x1dd   :  { %v707_v26 = vpop.f32.mrf.mxu3 }
 0x1de   :  { %v713_v27 = vadd.f32 %v707_v26, %v609_v25 }
 0x1df   :  { %988 = vmatpush.bf16.msrb.mxu2 %v2529_v3  ;;  %v2916_v3 = vld [vmem:[%s3072_s4] sm:$0xff] }
 0x1e0   :  { %v723_v29 = vadd.f32 %v719_v28, %v713_v27 }
 0x1e2   :  { %v729_v31 = vadd.f32 %v2603_v57, %v723_v29 }
 0x1e3   :  { %989 = vmatpush.bf16.msrb.mxu2 %v2528_v7  ;;  %v2919_v7 = vld [vmem:[#allocation2 + $0x298] sm:$0xff] }
 0x1e4   :  { %v733_v33 = vmax.f32 %v729_v31, 0.0 }
 0x1e6   :  { %v751_v34 = vpack.c.bf16 %v733_v33, %v732_v32 }
 0x1e7   :  { %990 = vmatpush.bf16.msrb.mxu2 %v2527_v9  ;;  %v2927_v9 = vld [vmem:[%s3072_s4 + $0x8] sm:$0xff] }
 0x1e8   :  { %815 = vmatmul.bf16.gmra.mxu0 %v751_v34 }
 0x1eb   :  { %991 = vmatpush.bf16.msrb.mxu2 %v2526_v14  ;;  %v2931_v14 = vld [vmem:[#allocation2 + $0x290] sm:$0xff] }
 0x1f8   :  { %2258 = vmatmul.msk.bf16.vlgmr.msra.gmra.mxu0 %vm99_vm0, %v2743_v4  ;;  %v2520_v4 = vld [vmem:[#allocation2 + $0x190] sm:$0xff] }
 0x1f9   :  { %898 = vmatpush.bf16.msrb.mxu1 %v2520_v4 }
 0x1fd   :  { %899 = vmatpush.bf16.msrb.mxu1 %v2519_v39 }
 0x208   :  { %2259 = vmatmul.msk.bf16.gmra.mxu0 %vm99_vm0, %v2754_v10  ;;  %v2518_v10 = vld [vmem:[#allocation2 + $0x180] sm:$0xff] }
 0x209   :  { %900 = vmatpush.bf16.msrb.mxu1 %v2518_v10 }
 0x20d   :  { %1205 = vmatpush.bf16.msra.mxu1 %v2854_v60 }
 0x211   :  { %1206 = vmatpush.bf16.msra.mxu1 %v2861_v5 }
 0x215   :  { %1207 = vmatpush.bf16.msra.mxu1 %v2864_v8 }
 0x218   :  { %2260 = vmatmul.msk.bf16.gmra.mxu0 %vm99_vm0, %v2762_v11 }
 0x219   :  { %1208 = vmatpush.bf16.msra.mxu1 %v2867_v12 }
 0x21d   :  { %1209 = vmatpush.bf16.msra.mxu1 %v2870_v15 }
 0x221   :  { %1210 = vmatpush.bf16.msra.mxu1 %v2873_v16 }
 0x225   :  { %1211 = vmatpush.bf16.msra.mxu1 %v2876_v17 }
 0x228   :  { %2261 = vmatmul.msk.bf16.gmra.mxu0 %vm99_vm0, %v2769_v13 }
 0x229   :  { %1212 = vmatpush.bf16.msra.mxu1 %v2879_v18 }
 0x255   :  { %v811_v11 = vpop.f32.mrf.mxu0 }
 0x256   :  { %v812_v41 = vadd.f32 %v2605_v40, %v811_v11 }
 0x258   :  { %v821_v43 = vmax.f32 %v812_v41, 0.0 }
 0x25d   :  { %v813_v13 = vpop.f32.mrf.mxu0 }
 0x25e   :  { %v814_v42 = vadd.f32 %v2605_v40, %v813_v13 }
 0x260   :  { %v822_v44 = vmax.f32 %v814_v42, 0.0 }
 0x262   :  { %v841_v45 = vpack.c.bf16 %v822_v44, %v821_v43  ;;  %v2607_v44 = vld [vmem:[%s3075_s7 + $0x6] ss:$0 sm:$0xff] }
 0x264   :  { %901 = vmatmul.bf16.vlgmr.msrb.gmra.mxu1 %v841_v45 }
 0x265   :  { %v816_v46 = vpop.f32.mrf.mxu0 }
 0x266   :  { %v817_v48 = vadd.f32 %v2605_v40, %v816_v46 }
 0x268   :  { %v823_v51 = vmax.f32 %v817_v48, 0.0  ;;  %v2892_v48 = vld [vmem:[#allocation2 + $0x2b8] sm:$0xff] }
 0x269   :  { %1335 = vmatpush.bf16.msrb.mxu3 %v2892_v48 }
 0x26d   :  { %v818_v47 = vpop.f32.mrf.mxu0 }
 0x26e   :  { %v819_v49 = vadd.f32 %v2605_v40, %v818_v47 }
 0x270   :  { %v824_v52 = vmax.f32 %v819_v49, 0.0 }
 0x272   :  { %v842_v53 = vpack.c.bf16 %v824_v52, %v823_v51 }
 0x274   :  { %906 = vmatmul.bf16.gmra.mxu1 %v842_v53  ;;  %v2900_v53 = vld [vmem:[#allocation2 + $0x2b0] sm:$0xff] }
 0x275   :  { %v1099_v54 = vpop.f32.mrf.mxu0  ;;  %1336 = vmatpush.bf16.msrb.mxu3 %v2900_v53 }
 0x279   :  { %1337 = vmatpush.bf16.msrb.mxu3 %v2908_v62 }
 0x27d   :  { %v1101_v55 = vpop.f32.mrf.mxu0 }
 0x285   :  { %v2850_v57 = vpop.f32.mrf.mxu0 }
 0x28d   :  { %v2852_v58 = vpop.f32.mrf.mxu0 }
 0x295   :  { %v1109_v50 = vpop.f32.mrf.mxu0 }
 0x296   :  { %1123 = vrot.lane.b32.xlu2 %v1109_v50, %s2679_s16 }
 0x29d   :  { %v1111_v0 = vpop.f32.mrf.mxu0 }
 0x29e   :  { %1125 = vrot.lane.b32.xlu2 %v1111_v0, %s2679_s16 }
 0x2a5   :  { %v1114_v1 = vpop.f32.mrf.mxu0 }
 0x2a6   :  { %1127 = vrot.lane.b32.xlu0 %v1114_v1, %s2679_s16  ;;  %v2911_v1 = vld [vmem:[#allocation2 + $0x2a0] sm:$0xff] }
 0x2a7   :  { %1338 = vmatpush.bf16.msrb.mxu3 %v2911_v1 }
 0x2ab   :  { %1339 = vmatpush.bf16.msrb.mxu3 %v2919_v7 }
 0x2ad   :  { %v1116_v2 = vpop.f32.mrf.mxu0 }
 0x2ae   :  { %1129 = vrot.lane.b32.xlu1 %v1116_v2, %s2679_s16 }
 0x2af   :  { %1340 = vmatpush.bf16.msrb.mxu3 %v2931_v14 }
 0x2e1   :  { %v902_v19 = vpop.f32.mrf.mxu1 }
 0x2e2   :  { %v903_v21 = vadd.f32 %v2606_v20, %v902_v19  ;;  %v2551_v19 = vld [vmem:[#allocation2 + $0x288] sm:$0xff] }
 0x2e3   :  { %1341 = vmatpush.bf16.msrb.mxu3 %v2551_v19 }
 0x2e4   :  { %v912_v24 = vmax.f32 %v903_v21, 0.0 }
 0x2e9   :  { %v904_v22 = vpop.f32.mrf.mxu1 }
 0x2ea   :  { %v905_v23 = vadd.f32 %v2606_v20, %v904_v22 }
 0x2ec   :  { %v913_v25 = vmax.f32 %v905_v23, 0.0 }
 0x2ee   :  { %v932_v56 = vpack.c.bf16 %v913_v25, %v912_v24 }
 0x2f0   :  { %992 = vmatmul.bf16.vlgmr.msrb.gmra.mxu2 %v932_v56  ;;  %v1124_v26 = vpop.permute.xlu2 %1123 }
 0x2f1   :  { %v907_v27 = vpop.f32.mrf.mxu1  ;;  %v1135_v30 = vadd.f32 %v1124_v26, %v1099_v54 }
 0x2f2   :  { %v908_v28 = vadd.f32 %v2606_v20, %v907_v27 }
 0x2f4   :  { %v914_v6 = vmax.f32 %v908_v28, 0.0  ;;  %v74_v28 = vld [vmem:[%s3073_s5 + $0x8] sm:$0xff] }
 0x2f5   :  { %1369 = vperm.xlu0 %2599, %v74_v28  }
 0x2f8   :  { %v1126_v29 = vpop.permute.xlu2 %1125 }
 0x2f9   :  { %v1136_v31 = vadd.f32 %v1126_v29, %v1101_v55  ;;  %v909_v32 = vpop.f32.mrf.mxu1 }
 0x2fa   :  { %v910_v33 = vadd.f32 %v2606_v20, %v909_v32  ;;  %v2550_v20 = vld [vmem:[#allocation2 + $0x280] sm:$0xff] }
 0x2fb   :  { %v1155_v34 = vpack.c.bf16 %v1136_v31, %v1135_v30  ;;  %1342 = vmatpush.bf16.msrb.mxu3 %v2550_v20 }
 0x2fc   :  { %v915_v35 = vmax.f32 %v910_v33, 0.0 }
 0x2fd   :  { %1213 = vmatmul.bf16.vlgmr.msra.gmra.mxu1 %v1155_v34 }
 0x2fe   :  { %v933_v36 = vpack.c.bf16 %v915_v35, %v914_v6 }
 0x2ff   :  { %1480 = vmatpush.bf16.msra.mxu3 %v2854_v60 }
 0x300   :  { %997 = vmatmul.bf16.gmra.mxu2 %v933_v36 }
 0x303   :  { %1481 = vmatpush.bf16.msra.mxu3 %v2861_v5  ;;  %v1080_v5 = vpop.f32.mrf.mxu3 }
 0x307   :  { %1482 = vmatpush.bf16.msra.mxu3 %v2864_v8 }
 0x30b   :  { %1483 = vmatpush.bf16.msra.mxu3 %v2867_v12  ;;  %v1082_v8 = vpop.f32.mrf.mxu3 }
 0x30f   :  { %1484 = vmatpush.bf16.msra.mxu3 %v2870_v15 }
 0x313   :  { %1485 = vmatpush.bf16.msra.mxu3 %v2873_v16  ;;  %v1085_v56 = vpop.f32.mrf.mxu3  ;;  %v2604_v16 = vld [vmem:[%s3075_s7 + $0x7] ss:$0 sm:$0xff] }
 0x314   :  { %v2953_v29 = vadd.f32 %v2604_v16, %v1082_v8  ;;  %v2958_v33 = vadd.f32 %v2604_v16, %v1080_v5 }
 0x317   :  { %1486 = vmatpush.bf16.msra.mxu3 %v2876_v17  ;;  %v2945_v17 = vadd.f32 %v2604_v16, %v1085_v56 }
 0x318   :  { %v1128_v37 = vpop.permute.xlu0 %1127 }
 0x319   :  { %v1137_v4 = vadd.f32 %v1128_v37, %v2850_v57 }
 0x31b   :  { %1487 = vmatpush.bf16.msra.mxu3 %v2879_v18  ;;  %v1087_v12 = vpop.f32.mrf.mxu3  ;;  %v75_v18 = vld [vmem:[%s3073_s5 + $0x10] sm:$0xff] }
 0x31c   :  { %v2955_v30 = vadd.f32 %v2604_v16, %v1087_v12  ;;  %1374 = vperm.xlu2 %2598, %v75_v18  }
 0x320   :  { %v1130_v38 = vpop.permute.xlu1 %1129 }
 0x321   :  { %v1138_v39 = vadd.f32 %v1130_v38, %v2852_v58  ;;  %v76_v38 = vld [vmem:[%s3073_s5 + $0x18] sm:$0xff] }
 0x323   :  { %v1156_v10 = vpack.c.bf16 %v1138_v39, %v1137_v4 }
 0x324   :  { %1379 = vperm.xlu2 %2598, %v76_v38  }
 0x325   :  { %1218 = vmatmul.bf16.gmra.mxu1 %v1156_v10 }
 0x373   :  { %v993_v11 = vpop.f32.mrf.mxu2 }
 0x374   :  { %v2902_v54 = vadd.f32 %v2607_v44, %v993_v11 }
 0x37a   :  { %v1214_v40 = vpop.f32.mrf.mxu1 }
 0x37b   :  { %v995_v41 = vpop.f32.mrf.mxu2  ;;  %v1224_v58 = vadd.f32 %v1214_v40, %v2902_v54  ;;  %v2969_v40 = vld [vmem:[%s3071_s3] sm:$0xff] }
 0x37c   :  { %v2894_v47 = vadd.f32 %v2607_v44, %v995_v41  ;;  %v73_v41 = vld [vmem:[%s3073_s5] sm:$0xff] }
 0x37d   :  { %v1228_v0 = vmax.f32 %v1224_v58, 0.0  ;;  %1364 = vperm.xlu2 %2598, %v73_v41  }
 0x382   :  { %v1216_v13 = vpop.f32.mrf.mxu1 }
 0x383   :  { %v998_v42 = vpop.f32.mrf.mxu2  ;;  %v1225_v55 = vadd.f32 %v1216_v13, %v2894_v47  ;;  %v2983_v13 = vld [vmem:[%s3071_s3 + $0x8] sm:$0xff] }
 0x384   :  { %v2890_v46 = vadd.f32 %v2607_v44, %v998_v42 }
 0x385   :  { %v1229_v50 = vmax.f32 %v1225_v55, 0.0 }
 0x387   :  { %v1232_v2 = vpack.c.bf16 %v1229_v50, %v1228_v0 }
 0x38b   :  { %v1000_v45 = vpop.f32.mrf.mxu2 }
 0x38c   :  { %v2896_v49 = vadd.f32 %v2607_v44, %v1000_v45  ;;  %v1370_v44 = vpop.permute.xlu0 %1369 }
 0x38d   :  { %v1383_v45 = vmul.f32 0.0, %v1370_v44 }
 0x3a2   :  { %v1219_v43 = vpop.f32.mrf.mxu1 }
 0x3a3   :  { %v1226_v51 = vadd.f32 %v1219_v43, %v2890_v46  ;;  %v2989_v43 = vpop.permute.xlu2 %1374 }
 0x3a4   :  { %v1384_v58 = vmul.f32 0.0, %v2989_v43 }
 0x3a5   :  { %v1230_v59 = vmax.f32 %v1226_v51, 0.0 }
 0x3aa   :  { %v1221_v52 = vpop.f32.mrf.mxu1 }
 0x3ab   :  { %v1227_v57 = vadd.f32 %v1221_v52, %v2896_v49 }
 0x3ad   :  { %v1231_v61 = vmax.f32 %v1227_v57, 0.0 }
 0x3af   :  { %v1233_v63 = vpack.c.bf16 %v1231_v61, %v1230_v59 }
 0x3b1   :  { %1256 = vmatpush.bf16.msra.mxu2 %v1233_v63 }
 0x3b5   :  { %1257 = vmatpush.bf16.msra.mxu2 %v1232_v2 }
 0x3b8   :  { %2302 = vmatmul.msk.bf16.vlgmr.msra.gmra.mxu2 %vm99_vm0, %v2916_v3 }
 0x3c8   :  { %2303 = vmatmul.msk.bf16.gmra.mxu2 %vm99_vm0, %v2927_v9 }
 0x43b   :  { %v1259_v21 = vpop.f32.mrf.mxu2 }
 0x443   :  { %v1261_v22 = vpop.f32.mrf.mxu2 }
 0x444   :  { %v1285_v23 = vpack.c.bf16 %v1261_v22, %v1259_v21 }
 0x446   :  { %1343 = vmatmul.bf16.vlgmr.msrb.gmra.mxu3 %v1285_v23 }
 0x44b   :  { %v1264_v24 = vpop.f32.mrf.mxu2 }
 0x453   :  { %v1266_v60 = vpop.f32.mrf.mxu2 }
 0x454   :  { %v1286_v25 = vpack.c.bf16 %v1266_v60, %v1264_v24 }
 0x456   :  { %1348 = vmatmul.bf16.gmra.mxu3 %v1286_v25 }
 0x4c9   :  { %v1344_v26 = vpop.f32.mrf.mxu3 }
 0x4ca   :  { %v1354_v35 = vadd.f32 %v1344_v26, %v2958_v33 }
 0x4cc   :  { %v1358_v10 = vmax.f32 %v1354_v35, 0.0 }
 0x4d1   :  { %v1346_v15 = vpop.f32.mrf.mxu3 }
 0x4d2   :  { %v1355_v34 = vadd.f32 %v1346_v15, %v2953_v29 }
 0x4d4   :  { %v1359_v4 = vmax.f32 %v1355_v34, 0.0 }
 0x4d6   :  { %v1386_v11 = vpack.c.bf16 %v1359_v4, %v1358_v10 }
 0x4d9   :  { %v1349_v27 = vpop.f32.mrf.mxu3 }
 0x4da   :  { %v1356_v31 = vadd.f32 %v1349_v27, %v2945_v17 }
 0x4dc   :  { %v1360_v36 = vmax.f32 %v1356_v31, 0.0 }
 0x4e1   :  { %v1351_v32 = vpop.f32.mrf.mxu3 }
 0x4e2   :  { %v1357_v6 = vadd.f32 %v1351_v32, %v2955_v30 }
 0x4e4   :  { %v1361_v37 = vmax.f32 %v1357_v6, 0.0 }
 0x4e6   :  { %v1387_v39 = vpack.c.bf16 %v1361_v37, %v1360_v36 }
 0x4e8   :  { %1410 = vmatpush.bf16.msrb.mxu1 %v1387_v39 }
 0x4ec   :  { %1411 = vmatpush.bf16.msrb.mxu1 %v1386_v11 }
 0x4ef   :  { %2344 = vmatmul.msk.bf16.vlgmr.msrb.gmra.mxu1 %vm99_vm0, %v2969_v40 }
 0x4f0   :  { %1530 = vmatpush.bf16.msra.mxu1 %v2892_v48 }
 0x4f4   :  { %1531 = vmatpush.bf16.msra.mxu1 %v2900_v53  ;;  %v2993_v53 = vpop.permute.xlu2 %1379 }
 0x4f5   :  { %v1385_v59 = vmul.f32 0.0, %v2993_v53 }
 0x4f8   :  { %1532 = vmatpush.bf16.msra.mxu1 %v2908_v62 }
 0x4fc   :  { %1533 = vmatpush.bf16.msra.mxu1 %v2911_v1  ;;  %v2995_v57 = vpop.permute.xlu2 %1364 }
 0x4fd   :  { %v1382_v62 = vmul.f32 0.0, %v2995_v57 }
 0x4ff   :  { %2345 = vmatmul.msk.bf16.gmra.mxu1 %vm99_vm0, %v2983_v13 }
 0x500   :  { %1534 = vmatpush.bf16.msra.mxu1 %v2919_v7  ;;  %v2619_v7 = vld [vmem:[%s3070_s2 + $0x10] sm:$0xff] }
 0x504   :  { %1535 = vmatpush.bf16.msra.mxu1 %v2931_v14  ;;  %v2620_v14 = vld [vmem:[%s3070_s2 + $0x18] sm:$0xff] }
 0x508   :  { %1536 = vmatpush.bf16.msra.mxu1 %v2551_v19  ;;  %v2621_v19 = vld [vmem:[%s3070_s2 + $0x20] sm:$0xff] }
 0x50c   :  { %1537 = vmatpush.bf16.msra.mxu1 %v2550_v20  ;;  %v2622_v20 = vld [vmem:[%s3070_s2 + $0x28] sm:$0xff] }
 0x56c   :  { %v1413_v42 = vpop.f32.mrf.mxu1 }
 0x56d   :  { %v3006_v1 = vadd.f32 %v1413_v42, %v1382_v62 }
 0x574   :  { %v1415_v48 = vpop.f32.mrf.mxu1 }
 0x575   :  { %v1424_v51 = vadd.f32 %v1415_v48, %v1383_v45 }
 0x577   :  { %v2991_v52 = vmul.f32 %v1424_v51, %v1370_v44  ;;  %v1427_v2 = vpack.c.bf16 %v1424_v51, %v3006_v1 }
 0x57c   :  { %v1418_v55 = vpop.f32.mrf.mxu1 }
 0x57d   :  { %v3000_v50 = vadd.f32 %v1418_v55, %v1384_v58 }
 0x584   :  { %v1420_v61 = vpop.f32.mrf.mxu1 }
 0x585   :  { %v3002_v63 = vadd.f32 %v1420_v61, %v1385_v59  ;;  %v2565_v61 = vld [vmem:[#allocation2 + $0x2f8] sm:$0xff] }
 0x586   :  { %1677 = vmatpush.bf16.msrb.mxu1 %v2565_v61  ;;  %v2576_v61 = vld [vmem:[#allocation2 + $0x350] sm:$0xff] }
 0x587   :  { %v1428_v0 = vpack.c.bf16 %v3002_v63, %v3000_v50 }
 0x589   :  { %1435 = vmatpush.bf16.msrb.mxu2 %v1428_v0 }
 0x58d   :  { %1436 = vmatpush.bf16.msrb.mxu2 %v1427_v2 }
 0x590   :  { %2346 = vmatmul.msk.bf16.vlgmr.msrb.gmra.mxu2 %vm99_vm0, %v2619_v7 }
 0x5a0   :  { %2347 = vmatmul.msk.bf16.gmra.mxu2 %vm99_vm0, %v2620_v14 }
 0x5b0   :  { %2348 = vmatmul.msk.bf16.gmra.mxu2 %vm99_vm0, %v2621_v19 }
 0x5c0   :  { %2349 = vmatmul.msk.bf16.gmra.mxu2 %vm99_vm0, %v2622_v20  ;;  %v2563_v20 = vld [vmem:[#allocation2 + $0x2e8] sm:$0xff] }
 0x613   :  { %v1438_v21 = vpop.f32.mrf.mxu2 }
 0x61b   :  { %v1440_v22 = vpop.f32.mrf.mxu2 }
 0x623   :  { %v1443_v23 = vpop.f32.mrf.mxu2 }
 0x62b   :  { %v1445_v24 = vpop.f32.mrf.mxu2 }
 0x633   :  { %v1448_v60 = vpop.f32.mrf.mxu2 }
 0x634   :  { %1462 = vrot.lane.b32.xlu2 %v1448_v60, %s2679_s16  ;;  %v2561_v60 = vld [vmem:[#allocation2 + $0x2d8] sm:$0xff] }
 0x63b   :  { %v1450_v25 = vpop.f32.mrf.mxu2 }
 0x63c   :  { %1464 = vrot.lane.b32.xlu1 %v1450_v25, %s2679_s16 }
 0x643   :  { %v1453_v5 = vpop.f32.mrf.mxu2 }
 0x644   :  { %1466 = vrot.lane.b32.xlu2 %v1453_v5, %s2679_s16  ;;  %v2573_v5 = vld [vmem:[#allocation2 + $0x338] sm:$0xff] }
 0x645   :  { %1776 = vmatpush.bf16.msra.mxu2 %v2573_v5 }
 0x64b   :  { %v1455_v8 = vpop.f32.mrf.mxu2 }
 0x64c   :  { %1468 = vrot.lane.b32.xlu1 %v1455_v8, %s2679_s16  ;;  %v2572_v8 = vld [vmem:[#allocation2 + $0x330] sm:$0xff] }
 0x64d   :  { %1777 = vmatpush.bf16.msra.mxu2 %v2572_v8 }
 0x68e   :  { %v1463_v56 = vpop.permute.xlu2 %1462 }
 0x68f   :  { %v1474_v26 = vadd.f32 %v1463_v56, %v1438_v21  ;;  %v1557_v56 = vmul.f32 %v3006_v1, %v2995_v57 }
 0x69e   :  { %v1467_v16 = vpop.permute.xlu2 %1466 }
 0x69f   :  { %v1476_v28 = vadd.f32 %v1467_v16, %v1443_v23 }
 0x6ae   :  { %v1465_v12 = vpop.permute.xlu1 %1464 }
 0x6af   :  { %v1475_v15 = vadd.f32 %v1465_v12, %v1440_v22 }
 0x6b1   :  { %v1478_v27 = vpack.c.bf16 %v1475_v15, %v1474_v26  ;;  %v2571_v15 = vld [vmem:[#allocation2 + $0x328] sm:$0xff] }
 0x6b2   :  { %1778 = vmatpush.bf16.msra.mxu2 %v2571_v15  ;;  %v2610_v15 = vld [vmem:[%s3075_s7 + $0xa] ss:$0 sm:$0xff] }
 0x6b3   :  { %1488 = vmatmul.bf16.vlgmr.msra.gmra.mxu3 %v1478_v27  ;;  %v2570_v27 = vld [vmem:[#allocation2 + $0x320] sm:$0xff] }
 0x6b6   :  { %1779 = vmatpush.bf16.msra.mxu2 %v2570_v27 }
 0x6be   :  { %v1469_v18 = vpop.permute.xlu1 %1468 }
 0x6bf   :  { %v1477_v31 = vadd.f32 %v1469_v18, %v1445_v24  ;;  %v2562_v24 = vld [vmem:[#allocation2 + $0x2e0] sm:$0xff]  ;;  %v1559_v18 = vmul.f32 %v3000_v50, %v2989_v43  ;;  %v2567_v43 = vld [vmem:[#allocation2 + $0x308] sm:$0xff] }
 0x6c1   :  { %v1479_v32 = vpack.c.bf16 %v1477_v31, %v1476_v28  ;;  %v1560_v28 = vmul.f32 %v3002_v63, %v2993_v53  ;;  %v2566_v53 = vld [vmem:[#allocation2 + $0x300] sm:$0xff]  ;;  %v2608_v63 = vld [vmem:[%s3075_s7 + $0x8] ss:$0 sm:$0xff] }
 0x6c3   :  { %1493 = vmatmul.bf16.gmra.mxu3 %v1479_v32 }
 0x736   :  { %v1489_v34 = vpop.f32.mrf.mxu3 }
 0x737   :  { %v1499_v39 = vadd.f32 %v1489_v34, %v2902_v54  ;;  %v2569_v34 = vld [vmem:[#allocation2 + $0x318] sm:$0xff] }
 0x738   :  { %1780 = vmatpush.bf16.msra.mxu2 %v2569_v34 }
 0x739   :  { %v1503_v44 = vmax.f32 %v1499_v39, 0.0 }
 0x73e   :  { %v1491_v6 = vpop.f32.mrf.mxu3 }
 0x73f   :  { %v1500_v38 = vadd.f32 %v1491_v6, %v2894_v47  ;;  %v2568_v6 = vld [vmem:[#allocation2 + $0x310] sm:$0xff] }
 0x740   :  { %1781 = vmatpush.bf16.msra.mxu2 %v2568_v6 }
 0x741   :  { %v1504_v41 = vmax.f32 %v1500_v38, 0.0 }
 0x743   :  { %v1507_v45 = vpack.c.bf16 %v1504_v41, %v1503_v44 }
 0x744   :  { %1782 = vmatpush.bf16.msra.mxu2 %v2567_v43 }
 0x746   :  { %v1494_v35 = vpop.f32.mrf.mxu3 }
 0x747   :  { %v1501_v36 = vadd.f32 %v1494_v35, %v2890_v46 }
 0x748   :  { %1783 = vmatpush.bf16.msra.mxu2 %v2566_v53 }
 0x749   :  { %v1505_v10 = vmax.f32 %v1501_v36, 0.0 }
 0x74e   :  { %v1496_v37 = vpop.f32.mrf.mxu3 }
 0x74f   :  { %v1502_v4 = vadd.f32 %v1496_v37, %v2896_v49 }
 0x751   :  { %v1506_v11 = vmax.f32 %v1502_v4, 0.0 }
 0x753   :  { %v1508_v42 = vpack.c.bf16 %v1506_v11, %v1505_v10 }
 0x755   :  { %1515 = vmatpush.bf16.msrb.mxu0 %v1508_v42 }
 0x759   :  { %1516 = vmatpush.bf16.msrb.mxu0 %v1507_v45 }
 0x75c   :  { %2350 = vmatmul.msk.bf16.vlgmr.msrb.gmra.mxu0 %vm99_vm0, %v2916_v3  ;;  %v2564_v3 = vld [vmem:[#allocation2 + $0x2f0] sm:$0xff] }
 0x75d   :  { %1678 = vmatpush.bf16.msrb.mxu1 %v2564_v3 }
 0x761   :  { %1679 = vmatpush.bf16.msrb.mxu1 %v2563_v20 }
 0x765   :  { %1680 = vmatpush.bf16.msrb.mxu1 %v2562_v24 }
 0x769   :  { %1681 = vmatpush.bf16.msrb.mxu1 %v2561_v60 }
 0x76c   :  { %2351 = vmatmul.msk.bf16.gmra.mxu0 %vm99_vm0, %v2927_v9 }
 0x7d9   :  { %v1518_v46 = vpop.f32.mrf.mxu0 }
 0x7e1   :  { %v1520_v47 = vpop.f32.mrf.mxu0 }
 0x7e2   :  { %v1528_v48 = vpack.c.bf16 %v1520_v47, %v1518_v46 }
 0x7e4   :  { %1538 = vmatmul.bf16.vlgmr.msra.gmra.mxu1 %v1528_v48 }
 0x7e9   :  { %v1523_v49 = vpop.f32.mrf.mxu0 }
 0x7f1   :  { %v1525_v54 = vpop.f32.mrf.mxu0 }
 0x7f2   :  { %v1529_v51 = vpack.c.bf16 %v1525_v54, %v1523_v49  ;;  %v2581_v54 = vld [vmem:[#allocation2 + $0x378] sm:$0xff] }
 0x7f3   :  { %1875 = vmatpush.bf16.msrb.mxu2 %v2581_v54 }
 0x7f4   :  { %1543 = vmatmul.bf16.gmra.mxu1 %v1529_v51  ;;  %v2580_v51 = vld [vmem:[#allocation2 + $0x370] sm:$0xff] }
 0x7f7   :  { %1876 = vmatpush.bf16.msrb.mxu2 %v2580_v51 }
 0x861   :  { %v1539_v55 = vpop.f32.mrf.mxu1 }
 0x862   :  { %v1549_v7 = vadd.f32 %v1539_v55, %v2958_v33  ;;  %v2558_v33 = vld [vmem:[#allocation2 + $0x2c0] sm:$0xff]  ;;  %v2579_v55 = vld [vmem:[#allocation2 + $0x368] sm:$0xff] }
 0x863   :  { %1877 = vmatpush.bf16.msrb.mxu2 %v2579_v55 }
 0x864   :  { %v1553_v23 = vmax.f32 %v1549_v7, 0.0 }
 0x869   :  { %v1541_v58 = vpop.f32.mrf.mxu1 }
 0x86a   :  { %v1550_v2 = vadd.f32 %v1541_v58, %v2953_v29  ;;  %v2560_v29 = vld [vmem:[#allocation2 + $0x2d0] sm:$0xff]  ;;  %v2578_v58 = vld [vmem:[#allocation2 + $0x360] sm:$0xff] }
 0x86b   :  { %1682 = vmatpush.bf16.msrb.mxu1 %v2560_v29  ;;  %1878 = vmatpush.bf16.msrb.mxu2 %v2578_v58 }
 0x86c   :  { %v1554_v21 = vmax.f32 %v1550_v2, 0.0 }
 0x871   :  { %v1544_v59 = vpop.f32.mrf.mxu1 }
 0x872   :  { %v1551_v62 = vadd.f32 %v1544_v59, %v2945_v17  ;;  %v1561_v17 = vpack.c.bf16 %v1554_v21, %v1553_v23  ;;  %v2577_v59 = vld [vmem:[#allocation2 + $0x358] sm:$0xff] }
 0x873   :  { %1879 = vmatpush.bf16.msrb.mxu2 %v2577_v59 }
 0x874   :  { %v1555_v14 = vmax.f32 %v1551_v62, 0.0  ;;  %v2575_v62 = vld [vmem:[#allocation2 + $0x348] sm:$0xff] }
 0x877   :  { %1880 = vmatpush.bf16.msrb.mxu2 %v2576_v61 }
 0x879   :  { %v1546_v0 = vpop.f32.mrf.mxu1 }
 0x87a   :  { %v1552_v9 = vadd.f32 %v1546_v0, %v2955_v30  ;;  %v2559_v30 = vld [vmem:[#allocation2 + $0x2c8] sm:$0xff]  ;;  %v2574_v0 = vld [vmem:[#allocation2 + $0x340] sm:$0xff] }
 0x87b   :  { %1683 = vmatpush.bf16.msrb.mxu1 %v2559_v30  ;;  %1881 = vmatpush.bf16.msrb.mxu2 %v2575_v62 }
 0x87c   :  { %v1556_v19 = vmax.f32 %v1552_v9, 0.0 }
 0x87e   :  { %v1562_v22 = vpack.c.bf16 %v1556_v19, %v1555_v14  ;;  %v2609_v19 = vld [vmem:[%s3075_s7 + $0x9] ss:$0 sm:$0xff]  ;;  %s2680_s7 = smov [#allocation5]  }
 0x87f   :  { %1684 = vmatpush.bf16.msrb.mxu1 %v2558_v33  ;;  %1882 = vmatpush.bf16.msrb.mxu2 %v2574_v0  ;;  %s1909_s24 = sshll.u32 %s2680_s7, 4  ;;  %s1910_s24 = int_to_ptr.vmem [resolvable:$true] %s1909_s24 }
 0x880   :  { %1569 = vmatpush.bf16.msrb.mxu3 %v1562_v22 }
 0x884   :  { %1570 = vmatpush.bf16.msrb.mxu3 %v1561_v17 }
 0x887   :  { %2352 = vmatmul.msk.bf16.vlgmr.msrb.gmra.mxu3 %vm99_vm0, %v2969_v40 }
 0x888   :  { %2582 = vmatpush.bf16.msra.mxu3 %v2581_v54 }
 0x88c   :  { %2583 = vmatpush.bf16.msra.mxu3 %v2580_v51 }
 0x890   :  { %2584 = vmatpush.bf16.msra.mxu3 %v2579_v55 }
 0x894   :  { %2585 = vmatpush.bf16.msra.mxu3 %v2578_v58 }
 0x897   :  { %2353 = vmatmul.msk.bf16.gmra.mxu3 %vm99_vm0, %v2983_v13 }
 0x898   :  { %2586 = vmatpush.bf16.msra.mxu3 %v2577_v59 }
 0x89c   :  { %2587 = vmatpush.bf16.msra.mxu3 %v2576_v61 }
 0x8a0   :  { %2588 = vmatpush.bf16.msra.mxu3 %v2575_v62 }
 0x8a4   :  { %2589 = vmatpush.bf16.msra.mxu3 %v2574_v0 }
 0x90a   :  { %v1572_v25 = vpop.f32.mrf.mxu3 }
 0x90b   :  { %v1582_v26 = vadd.f32 %v1572_v25, %v1557_v56 }
 0x912   :  { %v1574_v12 = vpop.f32.mrf.mxu3 }
 0x913   :  { %v1583_v40 = vadd.f32 %v1574_v12, %v2991_v52  ;;  %v2463_v52 = vld [vmem:[%s3070_s2 + $0x30] sm:$0xff] }
 0x915   :  { %v1586_v13 = vpack.c.bf16 %v1583_v40, %v1582_v26 }
 0x917   :  { %1685 = vmatmul.bf16.vlgmr.msrb.gmra.mxu1 %v1586_v13 }
 0x91a   :  { %v1577_v16 = vpop.f32.mrf.mxu3 }
 0x91b   :  { %v1584_v57 = vadd.f32 %v1577_v16, %v1559_v18 }
 0x922   :  { %v1579_v31 = vpop.f32.mrf.mxu3 }
 0x923   :  { %v1585_v1 = vadd.f32 %v1579_v31, %v1560_v28 }
 0x925   :  { %v1587_v32 = vpack.c.bf16 %v1585_v1, %v1584_v57 }
 0x927   :  { %1602 = vmatpush.bf16.msra.mxu0 %v1587_v32  ;;  %1690 = vmatmul.bf16.gmra.mxu1 %v1587_v32 }
 0x92b   :  { %1603 = vmatpush.bf16.msra.mxu0 %v1586_v13 }
 0x92e   :  { %2358 = vmatmul.msk.bf16.vlgmr.msra.gmra.mxu0 %vm99_vm0, %v2463_v52 }
 0x994   :  { %v1686_v50 = vpop.f32.mrf.mxu1 }
 0x995   :  { %v1687_v35 = vadd.f32 %v2608_v63, %v1686_v50 }
 0x997   :  { %v1701_v38 = vmax.f32 %v1687_v35, 0.0 }
 0x99c   :  { %v1688_v36 = vpop.f32.mrf.mxu1 }
 0x99d   :  { %v1689_v37 = vadd.f32 %v2608_v63, %v1688_v36 }
 0x99f   :  { %v1702_v4 = vmax.f32 %v1689_v37, 0.0 }
 0x9a1   :  { %v1723_v39 = vpack.c.bf16 %v1702_v4, %v1701_v38 }
 0x9a3   :  { %1784 = vmatmul.bf16.vlgmr.msra.gmra.mxu2 %v1723_v39 }
 0x9a4   :  { %v1691_v10 = vpop.f32.mrf.mxu1 }
 0x9a5   :  { %v1692_v11 = vadd.f32 %v2608_v63, %v1691_v10 }
 0x9a7   :  { %v1703_v45 = vmax.f32 %v1692_v11, 0.0 }
 0x9ab   :  { %v1605_v41 = vpop.f32.mrf.mxu0 }
 0x9ac   :  { %v1693_v42 = vpop.f32.mrf.mxu1 }
 0x9ad   :  { %v1694_v44 = vadd.f32 %v2608_v63, %v1693_v42 }
 0x9af   :  { %v1704_v46 = vmax.f32 %v1694_v44, 0.0 }
 0x9b1   :  { %v1724_v47 = vpack.c.bf16 %v1704_v46, %v1703_v45 }
 0x9b3   :  { %v1607_v48 = vpop.f32.mrf.mxu0  ;;  %1789 = vmatmul.bf16.gmra.mxu2 %v1724_v47 }
 0x9b4   :  { %v1626_v49 = vpack.c.bf16 %v1607_v48, %v1605_v41 }
 0x9b6   :  { %1695 = vmatmul.bf16.gmra.mxu1 %v1626_v49 }
 0xa26   :  { %v1785_v3 = vpop.f32.mrf.mxu2 }
 0xa27   :  { %v1786_v8 = vadd.f32 %v2609_v19, %v1785_v3 }
 0xa29   :  { %v1800_v12 = vmax.f32 %v1786_v8, 0.0 }
 0xa2e   :  { %v1787_v2 = vpop.f32.mrf.mxu2 }
 0xa2f   :  { %v1788_v5 = vadd.f32 %v2609_v19, %v1787_v2 }
 0xa31   :  { %v1801_v56 = vmax.f32 %v1788_v5, 0.0 }
 0xa33   :  { %v1696_v9 = vpop.f32.mrf.mxu1  ;;  %v1822_v26 = vpack.c.bf16 %v1801_v56, %v1800_v12 }
 0xa34   :  { %v1697_v14 = vadd.f32 %v2608_v63, %v1696_v9 }
 0xa36   :  { %v1790_v7 = vpop.f32.mrf.mxu2  ;;  %v1705_v23 = vmax.f32 %v1697_v14, 0.0 }
 0xa37   :  { %v1791_v22 = vadd.f32 %v2609_v19, %v1790_v7 }
 0xa39   :  { %v1802_v30 = vmax.f32 %v1791_v22, 0.0 }
 0xa3b   :  { %v1698_v20 = vpop.f32.mrf.mxu1 }
 0xa3c   :  { %v1699_v21 = vadd.f32 %v2608_v63, %v1698_v20 }
 0xa3e   :  { %v1706_v24 = vmax.f32 %v1699_v21, 0.0  ;;  %v1792_v17 = vpop.f32.mrf.mxu2 }
 0xa3f   :  { %v1793_v60 = vadd.f32 %v2609_v19, %v1792_v17 }
 0xa40   :  { %v1725_v29 = vpack.c.bf16 %v1706_v24, %v1705_v23 }
 0xa41   :  { %v1803_v33 = vmax.f32 %v1793_v60, 0.0 }
 0xa42   :  { %1794 = vmatmul.bf16.gmra.mxu2 %v1725_v29 }
 0xa43   :  { %v1823_v25 = vpack.c.bf16 %v1803_v33, %v1802_v30 }
 0xa45   :  { %1888 = vmatmul.bf16.vlgmr.msra.gmra.mxu3 %v1823_v25 }
 0xa52   :  { %1883 = vmatmul.bf16.vlgmr.msrb.gmra.mxu2 %v1822_v26 }
 0xac5   :  { %v1795_v40 = vpop.f32.mrf.mxu2 }
 0xac6   :  { %v1796_v16 = vadd.f32 %v2609_v19, %v1795_v40 }
 0xac8   :  { %v1889_v13 = vpop.f32.mrf.mxu3  ;;  %v1804_v31 = vmax.f32 %v1796_v16, 0.0 }
 0xac9   :  { %v1890_v27 = vadd.f32 %v2610_v15, %v1889_v13 }
 0xacb   :  { %1901 = vst [vmem:[#allocation5 + $0x10] sm:$0xff] %v1890_v27 }
 0xacd   :  { %v1797_v18 = vpop.f32.mrf.mxu2 }
 0xace   :  { %v1798_v28 = vadd.f32 %v2609_v19, %v1797_v18 }
 0xad0   :  { %v1805_v57 = vmax.f32 %v1798_v28, 0.0  ;;  %v1891_v1 = vpop.f32.mrf.mxu3 }
 0xad1   :  { %v1892_v32 = vadd.f32 %v2610_v15, %v1891_v1 }
 0xad2   :  { %v1824_v52 = vpack.c.bf16 %v1805_v57, %v1804_v31 }
 0xad3   :  { %1902 = vst [vmem:[#allocation5 + $0x18] sm:$0xff] %v1892_v32 }
 0xad4   :  { %1893 = vmatmul.bf16.gmra.mxu3 %v1824_v52 }
 0xad5   :  { %v1884_v34 = vpop.f32.mrf.mxu2 }
 0xad6   :  { %v1885_v6 = vadd.f32 %v2610_v15, %v1884_v34 }
 0xad8   :  { %1899 = vst [vmem:[#allocation5] sm:$0xff] %v1885_v6 }
 0xadd   :  { %v1886_v43 = vpop.f32.mrf.mxu2 }
 0xade   :  { %v1887_v53 = vadd.f32 %v2610_v15, %v1886_v43 }
 0xae0   :  { %1900 = vst [vmem:[#allocation5 + $0x8] sm:$0xff] %v1887_v53 }
 0xb57   :  { %v1894_v50 = vpop.f32.mrf.mxu3 }
 0xb58   :  { %v1895_v63 = vadd.f32 %v2610_v15, %v1894_v50 }
 0xb5a   :  { %1903 = vst [vmem:[#allocation5 + $0x20] sm:$0xff] %v1895_v63 }
 0xb5f   :  { %v1896_v35 = vpop.f32.mrf.mxu3 }
 0xb60   :  { %v1897_v36 = vadd.f32 %v2610_v15, %v1896_v35 }
 0xb62   :  { %1904 = vst [vmem:[#allocation5 + $0x28] sm:$0xff] %v1897_v36 }
 0xb63   :  { %1917 = dma.vmem_to_hbm [thread:$0]  %s1910_s24, 768, %s1912_s27, [#allocation4], %s2681_s28, %s2681_s28, %s2682_s29  }
 0xb64   :  { %2673 = dma.done.wait [#allocation4], 768  }
 0xb65   :  { %2674 = vsyncadd [#allocation4], 4294966528 }
 0xb66   :  { %1922 = vsyncpa [#allocation3], 1 }
 0xb67   :  { %1923 = vsyncpa [#allocation4], 1 }

</bundles_post_ra>
